<compile_context>
chip_gen: v5e
topology: v5e:2x2
jax: 0.10.0
libtpu: 0.0.40
codegen_flags: <defaults>
</compile_context>

<pallas_src>
import jax
import jax.numpy as jnp
from jax.experimental import pallas as pl
from jax.experimental.pallas import tpu as pltpu

NEG_SLOPE = 0.01   # F.leaky_relu default
_NEG_BIG = -1e9    # diagonal mask (equivalent to reference's  W - 1e8 * W_id)


def _leaky_relu(v):
    # max(v, 0.01*v) == leaky_relu(v) for 0 < slope < 1 (mul+max, no select)
    return jnp.maximum(v, NEG_SLOPE * v)


def _align(v, m):
    return ((v + m - 1) // m) * m


def _layout(input_features, nf, n_classes):
    """Static packing layout shared by init (packing) and the kernel (slicing)."""
    half = nf // 2
    f1 = input_features + half
    f2 = input_features + 2 * half
    # Wcompute conv chain (ratio 2,2,1,1): cin -> 2nf -> 2nf -> nf -> nf (-> 1)
    cmax = _align(max(input_features, f2, 2 * nf, nf), 16)   # bf16 sublane tile
    gout = max(half, n_classes)
    # Gconv sub-blocks inside gc_slab: [g1_x, g1_ax, g2_x, g2_ax, g3_x, g3_ax]
    g_fins = [input_features, input_features, f1, f1, f2, f2]
    g_couts = [half, half, half, half, n_classes, n_classes]
    g_offs, o = [], 0
    for fin in g_fins:
        g_offs.append(o)
        o += _align(fin, 16)        # keep row offsets bf16-tile aligned
    return dict(half=half, f1=f1, f2=f2, cmax=cmax, gout=gout,
                g_fins=g_fins, g_couts=g_couts, g_offs=g_offs, g_rows=o)


# ----------------------------------------------------------------------------
# Deterministic synthetic parameters (BN folded, inference mode) + slab packing
# ----------------------------------------------------------------------------
def _uniform(key, shape, bound):
    return jax.random.uniform(key, shape, jnp.float32, -bound, bound)


def _fold_bn(w, b, gamma, beta, mean, var, eps=1e-5):
    scale = gamma / jnp.sqrt(var + eps)
    return w * scale[None, :], (b - mean) * scale + beta


def _init_wcompute(key, in_feat, nf, ratio=(2, 2, 1, 1)):
    dims = [in_feat, nf * ratio[0], nf * ratio[1], nf * ratio[2], nf, 1]
    keys = jax.random.split(key, 20)
    layers, ki = [], 0
    for li in range(5):
        cin, cout = dims[li], dims[li + 1]
        bound = 1.0 / (cin ** 0.5)
        w = _uniform(keys[ki], (cin, cout), bound); ki += 1
        b = _uniform(keys[ki], (cout,), bound); ki += 1
        if li < 4:  # conv2d_1..4 carry BatchNorm2d; conv2d_last does not
            gamma = 1.0 + 0.1 * jax.random.normal(keys[ki], (cout,)); ki += 1
            beta = 0.1 * jax.random.normal(keys[ki], (cout,)); ki += 1
            w, b = _fold_bn(w, b, gamma, beta,
                            jnp.zeros((cout,), jnp.float32),
                            jnp.ones((cout,), jnp.float32))
        else:
            ki += 2
        layers.append((w, b))
    return layers


def _init_gconv(key, in_feat, out_feat, bn=True):
    num_in = 2 * in_feat   # J = 2 -> [x | A@x]
    keys = jax.random.split(key, 4)
    bound = 1.0 / (num_in ** 0.5)
    w = _uniform(keys[0], (num_in, out_feat), bound)
    b = _uniform(keys[1], (out_feat,), bound)
    if bn:  # BatchNorm1d folded (inference mode)
        gamma = 1.0 + 0.1 * jax.random.normal(keys[2], (out_feat,))
        beta = 0.1 * jax.random.normal(keys[3], (out_feat,))
        w, b = _fold_bn(w, b, gamma, beta,
                        jnp.zeros((out_feat,), jnp.float32),
                        jnp.ones((out_feat,), jnp.float32))
    return w, b


def gnn_n1_init(key, n_classes, input_features, nf):
    """Packed slabs for the kernel:
       wc (bf16): both Wcompute modules' 4 BN-folded conv weights, one
                  zero-padded (cmax, cmax) block per layer;
       gc (bf16): the 3 Gconv Linear weights pre-split into W_x / W_ax halves;
       vec (f32): all biases + the 1-channel conv2d_last weight rows."""
    lo = _layout(input_features, nf, n_classes)
    cmax, gout, half = lo["cmax"], lo["gout"], lo["half"]
    k = jax.random.split(key, 6)
    wc1 = _init_wcompute(k[0], input_features, nf)
    g1 = _init_gconv(k[1], input_features, half, bn=True)
    _ = _init_wcompute(k[2], lo["f1"], nf)   # module_w_2: its output W1 is never
                                             # consumed by GNN_n1.forward (dead)
    g2 = _init_gconv(k[3], lo["f1"], half, bn=True)
    wcl = _init_wcompute(k[4], lo["f2"], nf)
    g3 = _init_gconv(k[5], lo["f2"], n_classes, bn=False)

    wc_slab = jnp.zeros((2 * 4 * cmax, cmax), jnp.float32)
    vec_slab = jnp.zeros((16, cmax), jnp.float32)
    for m, layers in enumerate((wc1, wcl)):
        base, brow = m * 4 * cmax, m * 6
        for li in range(4):
            w, b = layers[li]
            r0 = base + li * cmax
            wc_slab = wc_slab.at[r0:r0 + w.shape[0], :w.shape[1]].set(w)
            vec_slab = vec_slab.at[brow + li, :b.shape[0]].set(b)
        wl, bl = layers[4]                       # (nf, 1), (1,)
        vec_slab = vec_slab.at[brow + 4, :wl.shape[0]].set(wl[:, 0])
        vec_slab = vec_slab.at[brow + 5, 0].set(bl[0])

    gc_slab = jnp.zeros((lo["g_rows"], gout), jnp.float32)
    for gi, (w, b) in enumerate((g1, g2, g3)):
        fin, cout = w.shape[0] // 2, w.shape[1]
        ox, oax = lo["g_offs"][2 * gi], lo["g_offs"][2 * gi + 1]
        gc_slab = gc_slab.at[ox:ox + fin, :cout].set(w[:fin])      # x half
        gc_slab = gc_slab.at[oax:oax + fin, :cout].set(w[fin:])    # A@x half
        vec_slab = vec_slab.at[12 + gi, :cout].set(b)

    return {"wc": wc_slab.astype(jnp.bfloat16),
            "gc": gc_slab.astype(jnp.bfloat16),
            "vec": vec_slab}


# ----------------------------------------------------------------------------
# Fused forward kernel + pallas_call wrapper
# ----------------------------------------------------------------------------
def make_gnn_n1_forward(num_nodes, input_features, nf, n_classes, b_tile=None):
    """Returns a jit-able forward(x, params) implementing GNN_n1.forward."""
    lo = _layout(input_features, nf, n_classes)
    cmax, half, f2 = lo["cmax"], lo["half"], lo["f2"]
    g_offs, g_fins, g_couts = lo["g_offs"], lo["g_fins"], lo["g_couts"]
    N = num_nodes

    def kernel(x_ref, wc_ref, gc_ref, vec_ref, out_ref):
        bt = x_ref.shape[0]                                 # static batch tile

        def wc_mlp(h, module, cin0):
            """4x (BN-folded 1x1 conv + leaky_relu) + 1-channel conv2d_last.
            Layers are stored as zero-padded (cmax, cmax) blocks so padded
            channels stay exactly 0 through the chain."""
            base, brow = module * 4 * cmax, module * 6
            h = _leaky_relu(
                jnp.dot(h.astype(jnp.bfloat16), wc_ref[base:base + cin0, :],
                        preferred_element_type=jnp.float32)
                + vec_ref[brow:brow + 1, :])
            for li in range(1, 4):
                r0 = base + li * cmax
                h = _leaky_relu(
                    jnp.dot(h.astype(jnp.bfloat16), wc_ref[r0:r0 + cmax, :],
                            preferred_element_type=jnp.float32)
                    + vec_ref[brow + li:brow + li + 1, :])
            # conv2d_last has one output channel: VPU multiply + lane reduce.
            wl = vec_ref[brow + 4:brow + 5, :]
            bl = vec_ref[brow + 5:brow + 6, 0:1]
            return jnp.sum(h * wl, axis=-1, keepdims=True) + bl

        def gdot(h, idx):
            off, fin, cout = g_offs[idx], g_fins[idx], g_couts[idx]
            return jnp.dot(h.astype(jnp.bfloat16),
                           gc_ref[off:off + fin, 0:cout],
                           preferred_element_type=jnp.float32)

        x_els = [x_ref[b] for b in range(bt)]               # each (N, F0) f32
        x0 = jnp.concatenate(x_els, axis=0)                 # (bt*N, F0)

        # ---- Wcompute-1: full N x N adjacency per element (all rows used) --
        d = jnp.concatenate(
            [jnp.abs(xe[:, None, :] - xe[None, :, :]).reshape(N * N, input_features)
             for xe in x_els], axis=0)                      # (bt*N*N, F0)
        s = wc_mlp(d, 0, input_features).reshape(bt * N, N)
        ii = jax.lax.broadcasted_iota(jnp.int32, (N, N), 0)
        jj = jax.lax.broadcasted_iota(jnp.int32, (N, N), 1)
        diag_neg = jnp.where(ii == jj, jnp.float32(_NEG_BIG), jnp.float32(0.0))
        s = s + jnp.concatenate([diag_neg] * bt, axis=0)    # mask i == j
        e = jnp.exp(s - jnp.max(s, axis=-1, keepdims=True))
        a = e * pl.reciprocal(jnp.sum(e, axis=-1, keepdims=True))   # (bt*N, N)

        def agg(h):   # per-element neighbour aggregation A @ h, tiny MXU dots
            return jnp.concatenate(
                [jnp.dot(a[b * N:(b + 1) * N, :].astype(jnp.bfloat16),
                         h[b * N:(b + 1) * N, :].astype(jnp.bfloat16),
                         preferred_element_type=jnp.float32)
                 for b in range(bt)], axis=0)

        ax0 = agg(x0)

        # ---- Gconv-1 (+ folded BN) + leaky_relu -----------------------------
        h1 = _leaky_relu(gdot(x0, 0) + gdot(ax0, 1) + vec_ref[12:13, 0:half])
        # ---- Gconv-2 (+ folded BN) + leaky_relu; reuses W0, per reference ---
        x1 = jnp.concatenate([x0, h1], axis=-1)              # (bt*N, f1)
        ax1 = jnp.concatenate([ax0, agg(h1)], axis=-1)
        h2 = _leaky_relu(gdot(x1, 2) + gdot(ax1, 3) + vec_ref[13:14, 0:half])
        x2 = jnp.concatenate([x1, h2], axis=-1)               # (bt*N, f2)

        # ---- Wcompute-last: only node 0's adjacency row is ever consumed ----
        dl = jnp.concatenate(
            [jnp.abs(x2[b * N:b * N + 1, :] - x2[b * N:(b + 1) * N, :])
             for b in range(bt)], axis=0)                     # (bt*N, f2)
        sl = wc_mlp(dl, 1, f2).reshape(bt, N)
        j0 = jax.lax.broadcasted_iota(jnp.int32, (bt, N), 1)
        sl = jnp.where(j0 == 0, jnp.float32(_NEG_BIG), sl)    # diag entry of row 0
        el = jnp.exp(sl - jnp.max(sl, axis=-1, keepdims=True))
        al = el * pl.reciprocal(jnp.sum(el, axis=-1, keepdims=True))  # (bt, N)

        ax_last = jnp.concatenate(
            [jnp.dot(al[b:b + 1, :].astype(jnp.bfloat16),
                     x2[b * N:(b + 1) * N, :].astype(jnp.bfloat16),
                     preferred_element_type=jnp.float32)
             for b in range(bt)], axis=0)                     # (bt, f2)
        x2_row0 = jnp.concatenate(
            [x2[b * N:b * N + 1, :] for b in range(bt)], axis=0)  # (bt, f2)

        # ---- Gconv-last (no BN, no relu); node-0 row only --------------------
        y = gdot(x2_row0, 4) + gdot(ax_last, 5) + vec_ref[14:15, 0:n_classes]
        out_ref[...] = y

    def forward(x, params):
        B = x.shape[0]
        assert x.shape == (B, N, input_features), x.shape
        # Default: batch 2 elements per grid step (single-TC v5e/v6e win).
        # Pass b_tile=1 to keep grid=(B,) for v7x megacore sharding.
        bt = b_tile if b_tile is not None else (2 if B % 2 == 0 else 1)
        assert B % bt == 0, (B, bt)
        wc, gc, vec = params["wc"], params["gc"], params["vec"]
        return pl.pallas_call(
            kernel,
            out_shape=jax.ShapeDtypeStruct((B, n_classes), jnp.float32),
            grid=(B // bt,),
            in_specs=[
                pl.BlockSpec((bt, N, input_features), lambda b: (b, 0, 0)),
                pl.BlockSpec(wc.shape, lambda b: (0, 0)),   # weights stay resident
                pl.BlockSpec(gc.shape, lambda b: (0, 0)),
                pl.BlockSpec(vec.shape, lambda b: (0, 0)),
            ],
            out_specs=pl.BlockSpec((bt, n_classes), lambda b: (b, 0)),
            compiler_params=pltpu.CompilerParams(
                dimension_semantics=("parallel",)),
        )(x, wc, gc, vec)

    return forward


if __name__ == "__main__":
    B, NUM_NODES, IN_FEATURES, NF, N_CLASSES = 2, 8, 16, 16, 8
    key = jax.random.PRNGKey(0)
    kx, kp = jax.random.split(key)
    x = jax.random.normal(kx, (B, NUM_NODES, IN_FEATURES), jnp.float32)
    params = gnn_n1_init(kp, N_CLASSES, IN_FEATURES, NF)

    fwd = jax.jit(make_gnn_n1_forward(NUM_NODES, IN_FEATURES, NF, N_CLASSES))
    out = jax.block_until_ready(fwd(x, params))
    assert out.shape == (B, N_CLASSES), out.shape
    assert bool(jnp.all(jnp.isfinite(out)))
    print("KERNEL_OK")
</pallas_src>

<mosaic_0001>
module attributes {stable_mosaic.version = 11 : i64} {
  func.func @kernel(%arg0: i32, %arg1: memref<2x8x16xf32, #tpu.memory_space<vmem>>, %arg2: memref<256x32xbf16, #tpu.memory_space<vmem>>, %arg3: memref<160x8xbf16, #tpu.memory_space<vmem>>, %arg4: memref<16x32xf32, #tpu.memory_space<vmem>>, %arg5: memref<2x8xf32, #tpu.memory_space<vmem>>) attributes {dimension_semantics = [#tpu.dimension_semantics<parallel>], iteration_bounds = array<i64: 1>, scalar_prefetch = 0 : i64, scratch_operands = 0 : i64, tpu.core_type = #tpu.core_type<tc>, window_params = [{transform_indices = @transform_0, window_bounds = array<i64: 2, 8, 16>}, {pipeline_mode = #tpu.pipeline_mode<synchronous>, transform_indices = @transform_1, window_bounds = array<i64: 256, 32>}, {pipeline_mode = #tpu.pipeline_mode<synchronous>, transform_indices = @transform_2, window_bounds = array<i64: 160, 8>}, {pipeline_mode = #tpu.pipeline_mode<synchronous>, transform_indices = @transform_3, window_bounds = array<i64: 16, 32>}, {transform_indices = @transform_4, window_bounds = array<i64: 2, 8>}]} {
    %c0 = arith.constant 0 : index
    %c0_0 = arith.constant 0 : index
    %c0_1 = arith.constant 0 : index
    %0 = vector.load %arg1[%c0, %c0_0, %c0_1] : memref<2x8x16xf32, #tpu.memory_space<vmem>>, vector<1x8x16xf32>
    %1 = vector.shape_cast %0 : vector<1x8x16xf32> to vector<8x16xf32>
    %c1 = arith.constant 1 : index
    %c0_2 = arith.constant 0 : index
    %c0_3 = arith.constant 0 : index
    %2 = vector.load %arg1[%c1, %c0_2, %c0_3] : memref<2x8x16xf32, #tpu.memory_space<vmem>>, vector<1x8x16xf32>
    %3 = vector.shape_cast %2 : vector<1x8x16xf32> to vector<8x16xf32>
    %4 = tpu.concatenate %1, %3 in 0 : vector<8x16xf32>, vector<8x16xf32> -> vector<16x16xf32>
    %5 = vector.shape_cast %1 : vector<8x16xf32> to vector<8x1x16xf32>
    %6 = vector.shape_cast %1 : vector<8x16xf32> to vector<1x8x16xf32>
    %7 = vector.broadcast %5 : vector<8x1x16xf32> to vector<8x8x16xf32>
    %8 = vector.broadcast %6 : vector<1x8x16xf32> to vector<8x8x16xf32>
    %9 = arith.subf %7, %8 : vector<8x8x16xf32>
    %10 = math.absf %9 : vector<8x8x16xf32>
    %11 = vector.shape_cast %10 : vector<8x8x16xf32> to vector<64x16xf32>
    %12 = vector.shape_cast %3 : vector<8x16xf32> to vector<8x1x16xf32>
    %13 = vector.shape_cast %3 : vector<8x16xf32> to vector<1x8x16xf32>
    %14 = vector.broadcast %12 : vector<8x1x16xf32> to vector<8x8x16xf32>
    %15 = vector.broadcast %13 : vector<1x8x16xf32> to vector<8x8x16xf32>
    %16 = arith.subf %14, %15 : vector<8x8x16xf32>
    %17 = math.absf %16 : vector<8x8x16xf32>
    %18 = vector.shape_cast %17 : vector<8x8x16xf32> to vector<64x16xf32>
    %19 = tpu.concatenate %11, %18 in 0 : vector<64x16xf32>, vector<64x16xf32> -> vector<128x16xf32>
    %20 = arith.truncf %19 : vector<128x16xf32> to vector<128x16xbf16>
    %c0_4 = arith.constant 0 : index
    %c0_5 = arith.constant 0 : index
    %21 = vector.load %arg2[%c0_4, %c0_5] : memref<256x32xbf16, #tpu.memory_space<vmem>>, vector<16x32xbf16>
    %cst = arith.constant dense<0.000000e+00> : vector<128x32xf32>
    %22 = tpu.matmul %20, %21, %cst {dimension_numbers = #tpu.dot_dimension_numbers<[1], [0], [0], [1], [0, 0, 1, 1], [], []>} : vector<128x16xbf16>, vector<16x32xbf16>, vector<128x32xf32> -> vector<128x32xf32>
    %c0_6 = arith.constant 0 : index
    %c0_7 = arith.constant 0 : index
    %23 = vector.load %arg4[%c0_6, %c0_7] : memref<16x32xf32, #tpu.memory_space<vmem>>, vector<1x32xf32>
    %24 = vector.broadcast %23 : vector<1x32xf32> to vector<128x32xf32>
    %25 = arith.addf %22, %24 : vector<128x32xf32>
    %cst_8 = arith.constant 0.00999999977 : f32
    %26 = vector.broadcast %cst_8 : f32 to vector<128x32xf32>
    %27 = arith.mulf %26, %25 : vector<128x32xf32>
    %28 = arith.maximumf %25, %27 : vector<128x32xf32>
    %29 = arith.truncf %28 : vector<128x32xf32> to vector<128x32xbf16>
    %c32 = arith.constant 32 : index
    %c0_9 = arith.constant 0 : index
    %30 = vector.load %arg2[%c32, %c0_9] : memref<256x32xbf16, #tpu.memory_space<vmem>>, vector<32x32xbf16>
    %cst_10 = arith.constant dense<0.000000e+00> : vector<128x32xf32>
    %31 = tpu.matmul %29, %30, %cst_10 {dimension_numbers = #tpu.dot_dimension_numbers<[1], [0], [0], [1], [0, 0, 1, 1], [], []>} : vector<128x32xbf16>, vector<32x32xbf16>, vector<128x32xf32> -> vector<128x32xf32>
    %c1_11 = arith.constant 1 : index
    %c0_12 = arith.constant 0 : index
    %32 = vector.load %arg4[%c1_11, %c0_12] : memref<16x32xf32, #tpu.memory_space<vmem>>, vector<1x32xf32>
    %33 = vector.broadcast %32 : vector<1x32xf32> to vector<128x32xf32>
    %34 = arith.addf %31, %33 : vector<128x32xf32>
    %cst_13 = arith.constant 0.00999999977 : f32
    %35 = vector.broadcast %cst_13 : f32 to vector<128x32xf32>
    %36 = arith.mulf %35, %34 : vector<128x32xf32>
    %37 = arith.maximumf %34, %36 : vector<128x32xf32>
    %38 = arith.truncf %37 : vector<128x32xf32> to vector<128x32xbf16>
    %c64 = arith.constant 64 : index
    %c0_14 = arith.constant 0 : index
    %39 = vector.load %arg2[%c64, %c0_14] : memref<256x32xbf16, #tpu.memory_space<vmem>>, vector<32x32xbf16>
    %cst_15 = arith.constant dense<0.000000e+00> : vector<128x32xf32>
    %40 = tpu.matmul %38, %39, %cst_15 {dimension_numbers = #tpu.dot_dimension_numbers<[1], [0], [0], [1], [0, 0, 1, 1], [], []>} : vector<128x32xbf16>, vector<32x32xbf16>, vector<128x32xf32> -> vector<128x32xf32>
    %c2 = arith.constant 2 : index
    %c0_16 = arith.constant 0 : index
    %41 = vector.load %arg4[%c2, %c0_16] : memref<16x32xf32, #tpu.memory_space<vmem>>, vector<1x32xf32>
    %42 = vector.broadcast %41 : vector<1x32xf32> to vector<128x32xf32>
    %43 = arith.addf %40, %42 : vector<128x32xf32>
    %cst_17 = arith.constant 0.00999999977 : f32
    %44 = vector.broadcast %cst_17 : f32 to vector<128x32xf32>
    %45 = arith.mulf %44, %43 : vector<128x32xf32>
    %46 = arith.maximumf %43, %45 : vector<128x32xf32>
    %47 = arith.truncf %46 : vector<128x32xf32> to vector<128x32xbf16>
    %c96 = arith.constant 96 : index
    %c0_18 = arith.constant 0 : index
    %48 = vector.load %arg2[%c96, %c0_18] : memref<256x32xbf16, #tpu.memory_space<vmem>>, vector<32x32xbf16>
    %cst_19 = arith.constant dense<0.000000e+00> : vector<128x32xf32>
    %49 = tpu.matmul %47, %48, %cst_19 {dimension_numbers = #tpu.dot_dimension_numbers<[1], [0], [0], [1], [0, 0, 1, 1], [], []>} : vector<128x32xbf16>, vector<32x32xbf16>, vector<128x32xf32> -> vector<128x32xf32>
    %c3 = arith.constant 3 : index
    %c0_20 = arith.constant 0 : index
    %50 = vector.load %arg4[%c3, %c0_20] : memref<16x32xf32, #tpu.memory_space<vmem>>, vector<1x32xf32>
    %51 = vector.broadcast %50 : vector<1x32xf32> to vector<128x32xf32>
    %52 = arith.addf %49, %51 : vector<128x32xf32>
    %cst_21 = arith.constant 0.00999999977 : f32
    %53 = vector.broadcast %cst_21 : f32 to vector<128x32xf32>
    %54 = arith.mulf %53, %52 : vector<128x32xf32>
    %55 = arith.maximumf %52, %54 : vector<128x32xf32>
    %c4 = arith.constant 4 : index
    %c0_22 = arith.constant 0 : index
    %56 = vector.load %arg4[%c4, %c0_22] : memref<16x32xf32, #tpu.memory_space<vmem>>, vector<1x32xf32>
    %c5 = arith.constant 5 : index
    %c0_23 = arith.constant 0 : index
    %57 = vector.load %arg4[%c5, %c0_23] : memref<16x32xf32, #tpu.memory_space<vmem>>, vector<1x1xf32>
    %58 = vector.broadcast %56 : vector<1x32xf32> to vector<128x32xf32>
    %59 = arith.mulf %55, %58 : vector<128x32xf32>
    %cst_24 = arith.constant dense<0.000000e+00> : vector<128xf32>
    %60 = vector.multi_reduction <add>, %59, %cst_24 [1] : vector<128x32xf32> to vector<128xf32>
    %61 = vector.shape_cast %60 : vector<128xf32> to vector<128x1xf32>
    %62 = vector.broadcast %57 : vector<1x1xf32> to vector<128x1xf32>
    %63 = arith.addf %61, %62 : vector<128x1xf32>
    %64 = vector.shape_cast %63 : vector<128x1xf32> to vector<16x8xf32>
    %65 = tpu.iota {dimensions = array<i32: 0>} : vector<8x8xi32>
    %66 = tpu.iota {dimensions = array<i32: 1>} : vector<8x8xi32>
    %67 = arith.cmpi eq, %65, %66 : vector<8x8xi32>
    %cst_25 = arith.constant -1.000000e+09 : f32
    %cst_26 = arith.constant 0.000000e+00 : f32
    %68 = vector.broadcast %cst_25 : f32 to vector<8x8xf32>
    %69 = vector.broadcast %cst_26 : f32 to vector<8x8xf32>
    %70 = arith.select %67, %68, %69 : vector<8x8xi1>, vector<8x8xf32>
    %71 = tpu.concatenate %70, %70 in 0 : vector<8x8xf32>, vector<8x8xf32> -> vector<16x8xf32>
    %72 = arith.addf %64, %71 : vector<16x8xf32>
    %cst_27 = arith.constant dense<0xFF800000> : vector<16xf32>
    %73 = vector.multi_reduction <maximumf>, %72, %cst_27 [1] : vector<16x8xf32> to vector<16xf32>
    %74 = vector.shape_cast %73 : vector<16xf32> to vector<16x1xf32>
    %75 = vector.broadcast %74 : vector<16x1xf32> to vector<16x8xf32>
    %76 = arith.subf %72, %75 : vector<16x8xf32>
    %77 = math.exp %76 : vector<16x8xf32>
    %cst_28 = arith.constant dense<0.000000e+00> : vector<16xf32>
    %78 = vector.multi_reduction <add>, %77, %cst_28 [1] : vector<16x8xf32> to vector<16xf32>
    %79 = vector.shape_cast %78 : vector<16xf32> to vector<16x1xf32>
    %80 = tpu.reciprocal %79 : vector<16x1xf32> -> vector<16x1xf32>
    %81 = vector.broadcast %80 : vector<16x1xf32> to vector<16x8xf32>
    %82 = arith.mulf %77, %81 : vector<16x8xf32>
    %83 = vector.extract_strided_slice %82 {offsets = [0, 0], sizes = [8, 8], strides = [1, 1]} : vector<16x8xf32> to vector<8x8xf32>
    %84 = arith.truncf %83 : vector<8x8xf32> to vector<8x8xbf16>
    %85 = vector.extract_strided_slice %4 {offsets = [0, 0], sizes = [8, 16], strides = [1, 1]} : vector<16x16xf32> to vector<8x16xf32>
    %86 = arith.truncf %85 : vector<8x16xf32> to vector<8x16xbf16>
    %cst_29 = arith.constant dense<0.000000e+00> : vector<8x16xf32>
    %87 = tpu.matmul %84, %86, %cst_29 {dimension_numbers = #tpu.dot_dimension_numbers<[1], [0], [0], [1], [0, 0, 1, 1], [], []>} : vector<8x8xbf16>, vector<8x16xbf16>, vector<8x16xf32> -> vector<8x16xf32>
    %88 = vector.extract_strided_slice %82 {offsets = [8, 0], sizes = [8, 8], strides = [1, 1]} : vector<16x8xf32> to vector<8x8xf32>
    %89 = arith.truncf %88 : vector<8x8xf32> to vector<8x8xbf16>
    %90 = vector.extract_strided_slice %4 {offsets = [8, 0], sizes = [8, 16], strides = [1, 1]} : vector<16x16xf32> to vector<8x16xf32>
    %91 = arith.truncf %90 : vector<8x16xf32> to vector<8x16xbf16>
    %cst_30 = arith.constant dense<0.000000e+00> : vector<8x16xf32>
    %92 = tpu.matmul %89, %91, %cst_30 {dimension_numbers = #tpu.dot_dimension_numbers<[1], [0], [0], [1], [0, 0, 1, 1], [], []>} : vector<8x8xbf16>, vector<8x16xbf16>, vector<8x16xf32> -> vector<8x16xf32>
    %93 = tpu.concatenate %87, %92 in 0 : vector<8x16xf32>, vector<8x16xf32> -> vector<16x16xf32>
    %94 = arith.truncf %4 : vector<16x16xf32> to vector<16x16xbf16>
    %c0_31 = arith.constant 0 : index
    %c0_32 = arith.constant 0 : index
    %95 = vector.load %arg3[%c0_31, %c0_32] : memref<160x8xbf16, #tpu.memory_space<vmem>>, vector<16x8xbf16>
    %cst_33 = arith.constant dense<0.000000e+00> : vector<16x8xf32>
    %96 = tpu.matmul %94, %95, %cst_33 {dimension_numbers = #tpu.dot_dimension_numbers<[1], [0], [0], [1], [0, 0, 1, 1], [], []>} : vector<16x16xbf16>, vector<16x8xbf16>, vector<16x8xf32> -> vector<16x8xf32>
    %97 = arith.truncf %93 : vector<16x16xf32> to vector<16x16xbf16>
    %c16 = arith.constant 16 : index
    %c0_34 = arith.constant 0 : index
    %98 = vector.load %arg3[%c16, %c0_34] : memref<160x8xbf16, #tpu.memory_space<vmem>>, vector<16x8xbf16>
    %cst_35 = arith.constant dense<0.000000e+00> : vector<16x8xf32>
    %99 = tpu.matmul %97, %98, %cst_35 {dimension_numbers = #tpu.dot_dimension_numbers<[1], [0], [0], [1], [0, 0, 1, 1], [], []>} : vector<16x16xbf16>, vector<16x8xbf16>, vector<16x8xf32> -> vector<16x8xf32>
    %100 = arith.addf %96, %99 : vector<16x8xf32>
    %c12 = arith.constant 12 : index
    %c0_36 = arith.constant 0 : index
    %101 = vector.load %arg4[%c12, %c0_36] : memref<16x32xf32, #tpu.memory_space<vmem>>, vector<1x8xf32>
    %102 = vector.broadcast %101 : vector<1x8xf32> to vector<16x8xf32>
    %103 = arith.addf %100, %102 : vector<16x8xf32>
    %cst_37 = arith.constant 0.00999999977 : f32
    %104 = vector.broadcast %cst_37 : f32 to vector<16x8xf32>
    %105 = arith.mulf %104, %103 : vector<16x8xf32>
    %106 = arith.maximumf %103, %105 : vector<16x8xf32>
    %107 = tpu.concatenate %4, %106 in 1 : vector<16x16xf32>, vector<16x8xf32> -> vector<16x24xf32>
    %108 = vector.extract_strided_slice %82 {offsets = [0, 0], sizes = [8, 8], strides = [1, 1]} : vector<16x8xf32> to vector<8x8xf32>
    %109 = arith.truncf %108 : vector<8x8xf32> to vector<8x8xbf16>
    %110 = vector.extract_strided_slice %106 {offsets = [0, 0], sizes = [8, 8], strides = [1, 1]} : vector<16x8xf32> to vector<8x8xf32>
    %111 = arith.truncf %110 : vector<8x8xf32> to vector<8x8xbf16>
    %cst_38 = arith.constant dense<0.000000e+00> : vector<8x8xf32>
    %112 = tpu.matmul %109, %111, %cst_38 {dimension_numbers = #tpu.dot_dimension_numbers<[1], [0], [0], [1], [0, 0, 1, 1], [], []>} : vector<8x8xbf16>, vector<8x8xbf16>, vector<8x8xf32> -> vector<8x8xf32>
    %113 = vector.extract_strided_slice %82 {offsets = [8, 0], sizes = [8, 8], strides = [1, 1]} : vector<16x8xf32> to vector<8x8xf32>
    %114 = arith.truncf %113 : vector<8x8xf32> to vector<8x8xbf16>
    %115 = vector.extract_strided_slice %106 {offsets = [8, 0], sizes = [8, 8], strides = [1, 1]} : vector<16x8xf32> to vector<8x8xf32>
    %116 = arith.truncf %115 : vector<8x8xf32> to vector<8x8xbf16>
    %cst_39 = arith.constant dense<0.000000e+00> : vector<8x8xf32>
    %117 = tpu.matmul %114, %116, %cst_39 {dimension_numbers = #tpu.dot_dimension_numbers<[1], [0], [0], [1], [0, 0, 1, 1], [], []>} : vector<8x8xbf16>, vector<8x8xbf16>, vector<8x8xf32> -> vector<8x8xf32>
    %118 = tpu.concatenate %112, %117 in 0 : vector<8x8xf32>, vector<8x8xf32> -> vector<16x8xf32>
    %119 = tpu.concatenate %93, %118 in 1 : vector<16x16xf32>, vector<16x8xf32> -> vector<16x24xf32>
    %120 = arith.truncf %107 : vector<16x24xf32> to vector<16x24xbf16>
    %c32_40 = arith.constant 32 : index
    %c0_41 = arith.constant 0 : index
    %121 = vector.load %arg3[%c32_40, %c0_41] : memref<160x8xbf16, #tpu.memory_space<vmem>>, vector<24x8xbf16>
    %cst_42 = arith.constant dense<0.000000e+00> : vector<16x8xf32>
    %122 = tpu.matmul %120, %121, %cst_42 {dimension_numbers = #tpu.dot_dimension_numbers<[1], [0], [0], [1], [0, 0, 1, 1], [], []>} : vector<16x24xbf16>, vector<24x8xbf16>, vector<16x8xf32> -> vector<16x8xf32>
    %123 = arith.truncf %119 : vector<16x24xf32> to vector<16x24xbf16>
    %c64_43 = arith.constant 64 : index
    %c0_44 = arith.constant 0 : index
    %124 = vector.load %arg3[%c64_43, %c0_44] : memref<160x8xbf16, #tpu.memory_space<vmem>>, vector<24x8xbf16>
    %cst_45 = arith.constant dense<0.000000e+00> : vector<16x8xf32>
    %125 = tpu.matmul %123, %124, %cst_45 {dimension_numbers = #tpu.dot_dimension_numbers<[1], [0], [0], [1], [0, 0, 1, 1], [], []>} : vector<16x24xbf16>, vector<24x8xbf16>, vector<16x8xf32> -> vector<16x8xf32>
    %126 = arith.addf %122, %125 : vector<16x8xf32>
    %c13 = arith.constant 13 : index
    %c0_46 = arith.constant 0 : index
    %127 = vector.load %arg4[%c13, %c0_46] : memref<16x32xf32, #tpu.memory_space<vmem>>, vector<1x8xf32>
    %128 = vector.broadcast %127 : vector<1x8xf32> to vector<16x8xf32>
    %129 = arith.addf %126, %128 : vector<16x8xf32>
    %cst_47 = arith.constant 0.00999999977 : f32
    %130 = vector.broadcast %cst_47 : f32 to vector<16x8xf32>
    %131 = arith.mulf %130, %129 : vector<16x8xf32>
    %132 = arith.maximumf %129, %131 : vector<16x8xf32>
    %133 = tpu.concatenate %107, %132 in 1 : vector<16x24xf32>, vector<16x8xf32> -> vector<16x32xf32>
    %134 = vector.extract_strided_slice %133 {offsets = [0, 0], sizes = [1, 32], strides = [1, 1]} : vector<16x32xf32> to vector<1x32xf32>
    %135 = vector.extract_strided_slice %133 {offsets = [0, 0], sizes = [8, 32], strides = [1, 1]} : vector<16x32xf32> to vector<8x32xf32>
    %136 = vector.broadcast %134 : vector<1x32xf32> to vector<8x32xf32>
    %137 = arith.subf %136, %135 : vector<8x32xf32>
    %138 = math.absf %137 : vector<8x32xf32>
    %139 = vector.extract_strided_slice %133 {offsets = [8, 0], sizes = [1, 32], strides = [1, 1]} : vector<16x32xf32> to vector<1x32xf32>
    %140 = vector.extract_strided_slice %133 {offsets = [8, 0], sizes = [8, 32], strides = [1, 1]} : vector<16x32xf32> to vector<8x32xf32>
    %141 = vector.broadcast %139 : vector<1x32xf32> to vector<8x32xf32>
    %142 = arith.subf %141, %140 : vector<8x32xf32>
    %143 = math.absf %142 : vector<8x32xf32>
    %144 = tpu.concatenate %138, %143 in 0 : vector<8x32xf32>, vector<8x32xf32> -> vector<16x32xf32>
    %145 = arith.truncf %144 : vector<16x32xf32> to vector<16x32xbf16>
    %c128 = arith.constant 128 : index
    %c0_48 = arith.constant 0 : index
    %146 = vector.load %arg2[%c128, %c0_48] : memref<256x32xbf16, #tpu.memory_space<vmem>>, vector<32x32xbf16>
    %cst_49 = arith.constant dense<0.000000e+00> : vector<16x32xf32>
    %147 = tpu.matmul %145, %146, %cst_49 {dimension_numbers = #tpu.dot_dimension_numbers<[1], [0], [0], [1], [0, 0, 1, 1], [], []>} : vector<16x32xbf16>, vector<32x32xbf16>, vector<16x32xf32> -> vector<16x32xf32>
    %c6 = arith.constant 6 : index
    %c0_50 = arith.constant 0 : index
    %148 = vector.load %arg4[%c6, %c0_50] : memref<16x32xf32, #tpu.memory_space<vmem>>, vector<1x32xf32>
    %149 = vector.broadcast %148 : vector<1x32xf32> to vector<16x32xf32>
    %150 = arith.addf %147, %149 : vector<16x32xf32>
    %cst_51 = arith.constant 0.00999999977 : f32
    %151 = vector.broadcast %cst_51 : f32 to vector<16x32xf32>
    %152 = arith.mulf %151, %150 : vector<16x32xf32>
    %153 = arith.maximumf %150, %152 : vector<16x32xf32>
    %154 = arith.truncf %153 : vector<16x32xf32> to vector<16x32xbf16>
    %c160 = arith.constant 160 : index
    %c0_52 = arith.constant 0 : index
    %155 = vector.load %arg2[%c160, %c0_52] : memref<256x32xbf16, #tpu.memory_space<vmem>>, vector<32x32xbf16>
    %cst_53 = arith.constant dense<0.000000e+00> : vector<16x32xf32>
    %156 = tpu.matmul %154, %155, %cst_53 {dimension_numbers = #tpu.dot_dimension_numbers<[1], [0], [0], [1], [0, 0, 1, 1], [], []>} : vector<16x32xbf16>, vector<32x32xbf16>, vector<16x32xf32> -> vector<16x32xf32>
    %c7 = arith.constant 7 : index
    %c0_54 = arith.constant 0 : index
    %157 = vector.load %arg4[%c7, %c0_54] : memref<16x32xf32, #tpu.memory_space<vmem>>, vector<1x32xf32>
    %158 = vector.broadcast %157 : vector<1x32xf32> to vector<16x32xf32>
    %159 = arith.addf %156, %158 : vector<16x32xf32>
    %cst_55 = arith.constant 0.00999999977 : f32
    %160 = vector.broadcast %cst_55 : f32 to vector<16x32xf32>
    %161 = arith.mulf %160, %159 : vector<16x32xf32>
    %162 = arith.maximumf %159, %161 : vector<16x32xf32>
    %163 = arith.truncf %162 : vector<16x32xf32> to vector<16x32xbf16>
    %c192 = arith.constant 192 : index
    %c0_56 = arith.constant 0 : index
    %164 = vector.load %arg2[%c192, %c0_56] : memref<256x32xbf16, #tpu.memory_space<vmem>>, vector<32x32xbf16>
    %cst_57 = arith.constant dense<0.000000e+00> : vector<16x32xf32>
    %165 = tpu.matmul %163, %164, %cst_57 {dimension_numbers = #tpu.dot_dimension_numbers<[1], [0], [0], [1], [0, 0, 1, 1], [], []>} : vector<16x32xbf16>, vector<32x32xbf16>, vector<16x32xf32> -> vector<16x32xf32>
    %c8 = arith.constant 8 : index
    %c0_58 = arith.constant 0 : index
    %166 = vector.load %arg4[%c8, %c0_58] : memref<16x32xf32, #tpu.memory_space<vmem>>, vector<1x32xf32>
    %167 = vector.broadcast %166 : vector<1x32xf32> to vector<16x32xf32>
    %168 = arith.addf %165, %167 : vector<16x32xf32>
    %cst_59 = arith.constant 0.00999999977 : f32
    %169 = vector.broadcast %cst_59 : f32 to vector<16x32xf32>
    %170 = arith.mulf %169, %168 : vector<16x32xf32>
    %171 = arith.maximumf %168, %170 : vector<16x32xf32>
    %172 = arith.truncf %171 : vector<16x32xf32> to vector<16x32xbf16>
    %c224 = arith.constant 224 : index
    %c0_60 = arith.constant 0 : index
    %173 = vector.load %arg2[%c224, %c0_60] : memref<256x32xbf16, #tpu.memory_space<vmem>>, vector<32x32xbf16>
    %cst_61 = arith.constant dense<0.000000e+00> : vector<16x32xf32>
    %174 = tpu.matmul %172, %173, %cst_61 {dimension_numbers = #tpu.dot_dimension_numbers<[1], [0], [0], [1], [0, 0, 1, 1], [], []>} : vector<16x32xbf16>, vector<32x32xbf16>, vector<16x32xf32> -> vector<16x32xf32>
    %c9 = arith.constant 9 : index
    %c0_62 = arith.constant 0 : index
    %175 = vector.load %arg4[%c9, %c0_62] : memref<16x32xf32, #tpu.memory_space<vmem>>, vector<1x32xf32>
    %176 = vector.broadcast %175 : vector<1x32xf32> to vector<16x32xf32>
    %177 = arith.addf %174, %176 : vector<16x32xf32>
    %cst_63 = arith.constant 0.00999999977 : f32
    %178 = vector.broadcast %cst_63 : f32 to vector<16x32xf32>
    %179 = arith.mulf %178, %177 : vector<16x32xf32>
    %180 = arith.maximumf %177, %179 : vector<16x32xf32>
    %c10 = arith.constant 10 : index
    %c0_64 = arith.constant 0 : index
    %181 = vector.load %arg4[%c10, %c0_64] : memref<16x32xf32, #tpu.memory_space<vmem>>, vector<1x32xf32>
    %c11 = arith.constant 11 : index
    %c0_65 = arith.constant 0 : index
    %182 = vector.load %arg4[%c11, %c0_65] : memref<16x32xf32, #tpu.memory_space<vmem>>, vector<1x1xf32>
    %183 = vector.broadcast %181 : vector<1x32xf32> to vector<16x32xf32>
    %184 = arith.mulf %180, %183 : vector<16x32xf32>
    %cst_66 = arith.constant dense<0.000000e+00> : vector<16xf32>
    %185 = vector.multi_reduction <add>, %184, %cst_66 [1] : vector<16x32xf32> to vector<16xf32>
    %186 = vector.shape_cast %185 : vector<16xf32> to vector<16x1xf32>
    %187 = vector.broadcast %182 : vector<1x1xf32> to vector<16x1xf32>
    %188 = arith.addf %186, %187 : vector<16x1xf32>
    %189 = vector.shape_cast %188 : vector<16x1xf32> to vector<2x8xf32>
    %190 = tpu.iota {dimensions = array<i32: 1>} : vector<2x8xi32>
    %c0_i32 = arith.constant 0 : i32
    %191 = vector.broadcast %c0_i32 : i32 to vector<2x8xi32>
    %192 = arith.cmpi eq, %190, %191 : vector<2x8xi32>
    %cst_67 = arith.constant -1.000000e+09 : f32
    %193 = vector.broadcast %cst_67 : f32 to vector<2x8xf32>
    %194 = arith.select %192, %193, %189 : vector<2x8xi1>, vector<2x8xf32>
    %cst_68 = arith.constant dense<0xFF800000> : vector<2xf32>
    %195 = vector.multi_reduction <maximumf>, %194, %cst_68 [1] : vector<2x8xf32> to vector<2xf32>
    %196 = vector.shape_cast %195 : vector<2xf32> to vector<2x1xf32>
    %197 = vector.broadcast %196 : vector<2x1xf32> to vector<2x8xf32>
    %198 = arith.subf %194, %197 : vector<2x8xf32>
    %199 = math.exp %198 : vector<2x8xf32>
    %cst_69 = arith.constant dense<0.000000e+00> : vector<2xf32>
    %200 = vector.multi_reduction <add>, %199, %cst_69 [1] : vector<2x8xf32> to vector<2xf32>
    %201 = vector.shape_cast %200 : vector<2xf32> to vector<2x1xf32>
    %202 = tpu.reciprocal %201 : vector<2x1xf32> -> vector<2x1xf32>
    %203 = vector.broadcast %202 : vector<2x1xf32> to vector<2x8xf32>
    %204 = arith.mulf %199, %203 : vector<2x8xf32>
    %205 = vector.extract_strided_slice %204 {offsets = [0, 0], sizes = [1, 8], strides = [1, 1]} : vector<2x8xf32> to vector<1x8xf32>
    %206 = arith.truncf %205 : vector<1x8xf32> to vector<1x8xbf16>
    %207 = vector.extract_strided_slice %133 {offsets = [0, 0], sizes = [8, 32], strides = [1, 1]} : vector<16x32xf32> to vector<8x32xf32>
    %208 = arith.truncf %207 : vector<8x32xf32> to vector<8x32xbf16>
    %cst_70 = arith.constant dense<0.000000e+00> : vector<1x32xf32>
    %209 = tpu.matmul %206, %208, %cst_70 {dimension_numbers = #tpu.dot_dimension_numbers<[1], [0], [0], [1], [0, 0, 1, 1], [], []>} : vector<1x8xbf16>, vector<8x32xbf16>, vector<1x32xf32> -> vector<1x32xf32>
    %210 = vector.extract_strided_slice %204 {offsets = [1, 0], sizes = [1, 8], strides = [1, 1]} : vector<2x8xf32> to vector<1x8xf32>
    %211 = arith.truncf %210 : vector<1x8xf32> to vector<1x8xbf16>
    %212 = vector.extract_strided_slice %133 {offsets = [8, 0], sizes = [8, 32], strides = [1, 1]} : vector<16x32xf32> to vector<8x32xf32>
    %213 = arith.truncf %212 : vector<8x32xf32> to vector<8x32xbf16>
    %cst_71 = arith.constant dense<0.000000e+00> : vector<1x32xf32>
    %214 = tpu.matmul %211, %213, %cst_71 {dimension_numbers = #tpu.dot_dimension_numbers<[1], [0], [0], [1], [0, 0, 1, 1], [], []>} : vector<1x8xbf16>, vector<8x32xbf16>, vector<1x32xf32> -> vector<1x32xf32>
    %215 = tpu.concatenate %209, %214 in 0 : vector<1x32xf32>, vector<1x32xf32> -> vector<2x32xf32>
    %216 = vector.extract_strided_slice %133 {offsets = [0, 0], sizes = [1, 32], strides = [1, 1]} : vector<16x32xf32> to vector<1x32xf32>
    %217 = vector.extract_strided_slice %133 {offsets = [8, 0], sizes = [1, 32], strides = [1, 1]} : vector<16x32xf32> to vector<1x32xf32>
    %218 = tpu.concatenate %216, %217 in 0 : vector<1x32xf32>, vector<1x32xf32> -> vector<2x32xf32>
    %219 = arith.truncf %218 : vector<2x32xf32> to vector<2x32xbf16>
    %c96_72 = arith.constant 96 : index
    %c0_73 = arith.constant 0 : index
    %220 = vector.load %arg3[%c96_72, %c0_73] : memref<160x8xbf16, #tpu.memory_space<vmem>>, vector<32x8xbf16>
    %cst_74 = arith.constant dense<0.000000e+00> : vector<2x8xf32>
    %221 = tpu.matmul %219, %220, %cst_74 {dimension_numbers = #tpu.dot_dimension_numbers<[1], [0], [0], [1], [0, 0, 1, 1], [], []>} : vector<2x32xbf16>, vector<32x8xbf16>, vector<2x8xf32> -> vector<2x8xf32>
    %222 = arith.truncf %215 : vector<2x32xf32> to vector<2x32xbf16>
    %c128_75 = arith.constant 128 : index
    %c0_76 = arith.constant 0 : index
    %223 = vector.load %arg3[%c128_75, %c0_76] : memref<160x8xbf16, #tpu.memory_space<vmem>>, vector<32x8xbf16>
    %cst_77 = arith.constant dense<0.000000e+00> : vector<2x8xf32>
    %224 = tpu.matmul %222, %223, %cst_77 {dimension_numbers = #tpu.dot_dimension_numbers<[1], [0], [0], [1], [0, 0, 1, 1], [], []>} : vector<2x32xbf16>, vector<32x8xbf16>, vector<2x8xf32> -> vector<2x8xf32>
    %225 = arith.addf %221, %224 : vector<2x8xf32>
    %c14 = arith.constant 14 : index
    %c0_78 = arith.constant 0 : index
    %226 = vector.load %arg4[%c14, %c0_78] : memref<16x32xf32, #tpu.memory_space<vmem>>, vector<1x8xf32>
    %227 = vector.broadcast %226 : vector<1x8xf32> to vector<2x8xf32>
    %228 = arith.addf %225, %227 : vector<2x8xf32>
    %c0_79 = arith.constant 0 : index
    %c0_80 = arith.constant 0 : index
    %229 = vector.load %arg5[%c0_79, %c0_80] : memref<2x8xf32, #tpu.memory_space<vmem>>, vector<2x8xf32>
    tpu.vector_store %arg5[%c0_79, %c0_80], %228 {strides = array<i32>} : memref<2x8xf32, #tpu.memory_space<vmem>>, vector<2x8xf32>,
    return
  }
  func.func @transform_0(%arg0: i32) -> (i32, i32, i32) {
    %c0_i32 = arith.constant 0 : i32
    %c0_i32_0 = arith.constant 0 : i32
    %c0_i32_1 = arith.constant 0 : i32
    return %arg0, %c0_i32, %c0_i32_0 : i32, i32, i32
  }
  func.func @transform_1(%arg0: i32) -> (i32, i32) {
    %c0_i32 = arith.constant 0 : i32
    %c0_i32_0 = arith.constant 0 : i32
    %c0_i32_1 = arith.constant 0 : i32
    return %c0_i32, %c0_i32_0 : i32, i32
  }
  func.func @transform_2(%arg0: i32) -> (i32, i32) {
    %c0_i32 = arith.constant 0 : i32
    %c0_i32_0 = arith.constant 0 : i32
    %c0_i32_1 = arith.constant 0 : i32
    return %c0_i32, %c0_i32_0 : i32, i32
  }
  func.func @transform_3(%arg0: i32) -> (i32, i32) {
    %c0_i32 = arith.constant 0 : i32
    %c0_i32_0 = arith.constant 0 : i32
    %c0_i32_1 = arith.constant 0 : i32
    return %c0_i32, %c0_i32_0 : i32, i32
  }
  func.func @transform_4(%arg0: i32) -> (i32, i32) {
    %c0_i32 = arith.constant 0 : i32
    %c0_i32_0 = arith.constant 0 : i32
    return %arg0, %c0_i32 : i32, i32
  }
}

</mosaic_0001>

<bundles_post_ra>
// kernel: forward.1
= control target key start
LH: loop header
LB: loop body
LE: loop exit
PB: predicated region body
PF: predicated region fallthrough
CT: control target
= control target key end

     0   :  { %vm120_vm0 = vcmask 130048   ;;  %s2802_s0 = inlined_call_operand.vmem [shape: f32[2,8,16], index: 0, kind: input, shape index: {}]   ;;  %s2803_s1 = inlined_call_operand.vmem [shape: bf16[256,32], index: 1, kind: input, shape index: {}]   ;;  %s2804_s2 = inlined_call_operand.vmem [shape: bf16[160,8], index: 2, kind: input, shape index: {}]   ;;  %s2805_s3 = inlined_call_operand.vmem [shape: f32[16,32], index: 3, kind: input, shape index: {}]   ;;  %s2806_s4 = inlined_call_operand.hbm [shape: f32[2,8], index: 4, kind: output, shape index: {}]  }
   0x1   :  { %v2029_v0 = vld [vmem:[%s2803_s1] sm:$0xff] }
   0x2   :  { %v19_v1 = vld [vmem:[%s2802_s0] sm:$0xff]  ;;  %152 = vmatpush.bf16.msra.mxu0 %v2029_v0 }
   0x3   :  { %v23_v2 = vrot.slane %v19_v1, 1  ;;  %v30_v3 = vperm.slane %v19_v1, 0  ;;  %v24_v9 = vrot.slane %v19_v1, 2  ;;  %v25_v10 = vrot.slane %v19_v1, 3 }
   0x5   :  { %v31_v4 = vperm.slane %v23_v2, 0  ;;  %v46_v5 = vsub.f32 %v30_v3, %v19_v1 }
   0x7   :  { %v47_v6 = vsub.f32 %v31_v4, %v19_v1  ;;  %v54_v7 = vand.u32 2147483647, %v46_v5 }
   0x9   :  { %v55_v8 = vand.u32 2147483647, %v47_v6 }
   0xb   :  { %v102_v11 = vpack.c.bf16 %v55_v8, %v54_v7 }
   0xc   :  { %9 = vsyncpa [#allocation3], 0  ;;  %v32_v12 = vperm.slane %v24_v9, 0  ;;  %v33_v13 = vperm.slane %v25_v10, 0  ;;  %v26_v19 = vrot.slane %v19_v1, 4  ;;  %v27_v20 = vrot.slane %v19_v1, 5 }
   0xd   :  { %1893 = vmatmul.msk.bf16.vlgmr.msra.gmra.mxu0 %vm120_vm0, %v102_v11  ;;  %v28_v28 = vrot.slane %v19_v1, 6  ;;  %v29_v29 = vrot.slane %v19_v1, 7  ;;  %v1888_v36 = vld [vmem:[%s2802_s0 + $0x8] sm:$0xff]  ;;  %v2031_v6 = vld [vmem:[%s2803_s1 + $0x18] sm:$0xff]  ;;  %v2030_v9 = vld [vmem:[%s2803_s1 + $0x10] sm:$0xff]  ;;  %vm252_vm1 = vcmask 261120  }
   0xe   :  { %v48_v14 = vsub.f32 %v32_v12, %v19_v1  ;;  %v49_v15 = vsub.f32 %v33_v13, %v19_v1  ;;  %v34_v21 = vperm.slane %v26_v19, 0  ;;  %v35_v22 = vperm.slane %v27_v20, 0  ;;  %283 = vmatpush.bf16.msra.mxu1 %v2031_v6  ;;  %v2207_v12 = vld [vmem:[%s2805_s3] ss:$0 sm:$0xff]  ;;  %s2153_s28 = smov 16   ;;  %s2154_s15 = smov 24  }
   0xf   :  { %v36_v30 = vperm.slane %v28_v28, 0  ;;  %v37_v31 = vperm.slane %v29_v29, 0  ;;  %v63_v38 = vrot.slane %v1888_v36, 1  ;;  %v70_v39 = vperm.slane %v1888_v36, 0  ;;  %s2155_s23 = smov [#allocation2]   ;;  %s1879_s26 = sshll.u32 %s2806_s4, 4  ;;  %s1880_s26 = int_to_ptr.hbm [resolvable:$true] %s1879_s26 }
  0x10   :  { %v56_v16 = vand.u32 2147483647, %v48_v14  ;;  %v57_v17 = vand.u32 2147483647, %v49_v15  ;;  %v50_v23 = vsub.f32 %v34_v21, %v19_v1  ;;  %v51_v24 = vsub.f32 %v35_v22, %v19_v1  ;;  %s1877_s24 = sshll.u32 %s2155_s23, 4  ;;  %s1878_s24 = int_to_ptr.vmem [resolvable:$true] %s1877_s24 }
  0x11   :  { %v52_v32 = vsub.f32 %v36_v30, %v19_v1  ;;  %v53_v33 = vsub.f32 %v37_v31, %v19_v1  ;;  %v71_v40 = vperm.slane %v63_v38, 0  ;;  %v86_v41 = vsub.f32 %v70_v39, %v1888_v36 }
  0x12   :  { %v103_v18 = vpack.c.bf16 %v57_v17, %v56_v16  ;;  %v58_v25 = vand.u32 2147483647, %v50_v23  ;;  %v59_v26 = vand.u32 2147483647, %v51_v24  ;;  %v64_v46 = vrot.slane %v1888_v36, 2  ;;  %284 = vmatpush.bf16.msra.mxu1 %v2030_v9 }
  0x13   :  { %v60_v34 = vand.u32 2147483647, %v52_v32  ;;  %v61_v35 = vand.u32 2147483647, %v53_v33  ;;  %v87_v42 = vsub.f32 %v71_v40, %v1888_v36  ;;  %v94_v43 = vand.u32 2147483647, %v86_v41 }
  0x14   :  { %v104_v27 = vpack.c.bf16 %v59_v26, %v58_v25  ;;  %v65_v47 = vrot.slane %v1888_v36, 3  ;;  %v72_v48 = vperm.slane %v64_v46, 0  ;;  %v66_v55 = vrot.slane %v1888_v36, 4 }
  0x15   :  { %v105_v37 = vpack.c.bf16 %v61_v35, %v60_v34  ;;  %v95_v44 = vand.u32 2147483647, %v87_v42  ;;  %v67_v56 = vrot.slane %v1888_v36, 5  ;;  %v68_v0 = vrot.slane %v1888_v36, 6 }
  0x16   :  { %v73_v49 = vperm.slane %v65_v47, 0  ;;  %v88_v50 = vsub.f32 %v72_v48, %v1888_v36  ;;  %v74_v57 = vperm.slane %v66_v55, 0  ;;  %v69_v1 = vrot.slane %v1888_v36, 7 }
  0x17   :  { %v106_v45 = vpack.c.bf16 %v95_v44, %v94_v43  ;;  %v75_v58 = vperm.slane %v67_v56, 0  ;;  %v76_v2 = vperm.slane %v68_v0, 0  ;;  %vm871_vm3 = vcmask 1041409  }
  0x18   :  { %v89_v51 = vsub.f32 %v73_v49, %v1888_v36  ;;  %v96_v52 = vand.u32 2147483647, %v88_v50  ;;  %v90_v59 = vsub.f32 %v74_v57, %v1888_v36  ;;  %v77_v3 = vperm.slane %v69_v1, 0 }
  0x19   :  { %v91_v60 = vsub.f32 %v75_v58, %v1888_v36  ;;  %v92_v4 = vsub.f32 %v76_v2, %v1888_v36  ;;  %vm873_vm4 = vcmask 1042434   ;;  %vm875_vm5 = vcmask 1043459  }
  0x1a   :  { %v97_v53 = vand.u32 2147483647, %v89_v51  ;;  %v98_v61 = vand.u32 2147483647, %v90_v59  ;;  %v93_v5 = vsub.f32 %v77_v3, %v1888_v36  ;;  %vm877_vm6 = vcmask 1044484  }
  0x1b   :  { %v99_v62 = vand.u32 2147483647, %v91_v60  ;;  %v100_v7 = vand.u32 2147483647, %v92_v4  ;;  %vm879_vm7 = vcmask 1045509   ;;  %vm881_vm8 = vcmask 1046534  }
  0x1c   :  { %v107_v54 = vpack.c.bf16 %v97_v53, %v96_v52  ;;  %v101_v8 = vand.u32 2147483647, %v93_v5  ;;  %vm883_vm9 = vcmask 1047559   ;;  %vm894_vm10 = vcmask 64512  }
  0x1d   :  { %1894 = vmatmul.msk.bf16.gmra.mxu0 %vm120_vm0, %v103_v18  ;;  %v108_v63 = vpack.c.bf16 %v99_v62, %v98_v61 }
  0x1e   :  { %v109_v10 = vpack.c.bf16 %v101_v8, %v100_v7 }
  0x2d   :  { %1895 = vmatmul.msk.bf16.gmra.mxu0 %vm120_vm0, %v104_v27 }
  0x3d   :  { %1896 = vmatmul.msk.bf16.gmra.mxu0 %vm120_vm0, %v105_v37 }
  0x4d   :  { %1897 = vmatmul.msk.bf16.gmra.mxu0 %vm120_vm0, %v106_v45 }
  0x5d   :  { %1898 = vmatmul.msk.bf16.gmra.mxu0 %vm120_vm0, %v107_v54 }
  0x6d   :  { %1899 = vmatmul.msk.bf16.gmra.mxu0 %vm120_vm0, %v108_v63 }
  0x7d   :  { %1900 = vmatmul.msk.bf16.gmra.mxu0 %vm120_vm0, %v109_v10 }
  0x8a   :  { %v154_v11 = vpop.f32.mrf.mxu0 }
  0x8b   :  { %v155_v13 = vadd.f32 %v2207_v12, %v154_v11 }
  0x8d   :  { %v194_v15 = vmul.f32 0.01, %v155_v13 }
  0x8f   :  { %v210_v18 = vmax.f32 %v155_v13, %v194_v15 }
  0x92   :  { %v156_v14 = vpop.f32.mrf.mxu0 }
  0x93   :  { %v157_v16 = vadd.f32 %v2207_v12, %v156_v14  ;;  %v2033_v14 = vld [vmem:[%s2803_s1 + $0x28] sm:$0xff] }
  0x94   :  { %414 = vmatpush.bf16.msra.mxu2 %v2033_v14 }
  0x95   :  { %v195_v17 = vmul.f32 0.01, %v157_v16 }
  0x97   :  { %v211_v19 = vmax.f32 %v157_v16, %v195_v17 }
  0x99   :  { %v226_v20 = vpack.c.bf16 %v211_v19, %v210_v18  ;;  %v2032_v18 = vld [vmem:[%s2803_s1 + $0x20] sm:$0xff] }
  0x9a   :  { %v159_v21 = vpop.f32.mrf.mxu0  ;;  %415 = vmatpush.bf16.msra.mxu2 %v2032_v18 }
  0x9b   :  { %1909 = vmatmul.msk.bf16.vlgmr.msra.gmra.mxu1 %vm252_vm1, %v226_v20  ;;  %v160_v22 = vadd.f32 %v2207_v12, %v159_v21 }
  0x9d   :  { %v196_v24 = vmul.f32 0.01, %v160_v22 }
  0x9f   :  { %v212_v27 = vmax.f32 %v160_v22, %v196_v24  ;;  %v2242_v24 = vld [vmem:[%s2805_s3 + $0x1] ss:$0 sm:$0xff] }
  0xa2   :  { %v161_v23 = vpop.f32.mrf.mxu0 }
  0xa3   :  { %v162_v25 = vadd.f32 %v2207_v12, %v161_v23 }
  0xa5   :  { %v197_v26 = vmul.f32 0.01, %v162_v25 }
  0xa7   :  { %v213_v28 = vmax.f32 %v162_v25, %v197_v26 }
  0xa9   :  { %v227_v29 = vpack.c.bf16 %v213_v28, %v212_v27 }
  0xaa   :  { %v164_v30 = vpop.f32.mrf.mxu0 }
  0xab   :  { %1910 = vmatmul.msk.bf16.gmra.mxu1 %vm252_vm1, %v227_v29  ;;  %v165_v31 = vadd.f32 %v2207_v12, %v164_v30 }
  0xad   :  { %v198_v33 = vmul.f32 0.01, %v165_v31 }
  0xaf   :  { %v214_v36 = vmax.f32 %v165_v31, %v198_v33 }
  0xb2   :  { %v166_v32 = vpop.f32.mrf.mxu0 }
  0xb3   :  { %v167_v34 = vadd.f32 %v2207_v12, %v166_v32 }
  0xb5   :  { %v199_v35 = vmul.f32 0.01, %v167_v34 }
  0xb7   :  { %v215_v37 = vmax.f32 %v167_v34, %v199_v35 }
  0xb9   :  { %v228_v38 = vpack.c.bf16 %v215_v37, %v214_v36 }
  0xba   :  { %v169_v39 = vpop.f32.mrf.mxu0 }
  0xbb   :  { %1911 = vmatmul.msk.bf16.gmra.mxu1 %vm252_vm1, %v228_v38  ;;  %v170_v40 = vadd.f32 %v2207_v12, %v169_v39 }
  0xbd   :  { %v200_v42 = vmul.f32 0.01, %v170_v40 }
  0xbf   :  { %v216_v45 = vmax.f32 %v170_v40, %v200_v42 }
  0xc2   :  { %v171_v41 = vpop.f32.mrf.mxu0 }
  0xc3   :  { %v172_v43 = vadd.f32 %v2207_v12, %v171_v41 }
  0xc5   :  { %v201_v44 = vmul.f32 0.01, %v172_v43 }
  0xc7   :  { %v217_v46 = vmax.f32 %v172_v43, %v201_v44 }
  0xc9   :  { %v229_v47 = vpack.c.bf16 %v217_v46, %v216_v45 }
  0xca   :  { %v174_v48 = vpop.f32.mrf.mxu0 }
  0xcb   :  { %1912 = vmatmul.msk.bf16.gmra.mxu1 %vm252_vm1, %v229_v47  ;;  %v175_v49 = vadd.f32 %v2207_v12, %v174_v48 }
  0xcd   :  { %v202_v51 = vmul.f32 0.01, %v175_v49 }
  0xcf   :  { %v218_v54 = vmax.f32 %v175_v49, %v202_v51 }
  0xd2   :  { %v176_v50 = vpop.f32.mrf.mxu0 }
  0xd3   :  { %v177_v52 = vadd.f32 %v2207_v12, %v176_v50 }
  0xd5   :  { %v203_v53 = vmul.f32 0.01, %v177_v52 }
  0xd7   :  { %v219_v55 = vmax.f32 %v177_v52, %v203_v53 }
  0xd9   :  { %v230_v56 = vpack.c.bf16 %v219_v55, %v218_v54 }
  0xda   :  { %v179_v57 = vpop.f32.mrf.mxu0 }
  0xdb   :  { %1913 = vmatmul.msk.bf16.gmra.mxu1 %vm252_vm1, %v230_v56  ;;  %v180_v58 = vadd.f32 %v2207_v12, %v179_v57 }
  0xdd   :  { %v204_v60 = vmul.f32 0.01, %v180_v58 }
  0xdf   :  { %v220_v63 = vmax.f32 %v180_v58, %v204_v60 }
  0xe2   :  { %v181_v59 = vpop.f32.mrf.mxu0 }
  0xe3   :  { %v182_v61 = vadd.f32 %v2207_v12, %v181_v59 }
  0xe5   :  { %v205_v62 = vmul.f32 0.01, %v182_v61 }
  0xe7   :  { %v221_v0 = vmax.f32 %v182_v61, %v205_v62 }
  0xe9   :  { %v231_v1 = vpack.c.bf16 %v221_v0, %v220_v63 }
  0xea   :  { %v184_v2 = vpop.f32.mrf.mxu0 }
  0xeb   :  { %1914 = vmatmul.msk.bf16.gmra.mxu1 %vm252_vm1, %v231_v1  ;;  %v185_v3 = vadd.f32 %v2207_v12, %v184_v2 }
  0xed   :  { %v206_v5 = vmul.f32 0.01, %v185_v3 }
  0xef   :  { %v222_v8 = vmax.f32 %v185_v3, %v206_v5 }
  0xf2   :  { %v186_v4 = vpop.f32.mrf.mxu0 }
  0xf3   :  { %v187_v6 = vadd.f32 %v2207_v12, %v186_v4 }
  0xf5   :  { %v207_v7 = vmul.f32 0.01, %v187_v6 }
  0xf7   :  { %v223_v9 = vmax.f32 %v187_v6, %v207_v7 }
  0xf9   :  { %v232_v10 = vpack.c.bf16 %v223_v9, %v222_v8 }
  0xfa   :  { %v189_v11 = vpop.f32.mrf.mxu0 }
  0xfb   :  { %1915 = vmatmul.msk.bf16.gmra.mxu1 %vm252_vm1, %v232_v10  ;;  %v190_v13 = vadd.f32 %v2207_v12, %v189_v11 }
  0xfd   :  { %v208_v15 = vmul.f32 0.01, %v190_v13 }
  0xff   :  { %v224_v19 = vmax.f32 %v190_v13, %v208_v15 }
 0x102   :  { %v191_v16 = vpop.f32.mrf.mxu0 }
 0x103   :  { %v192_v17 = vadd.f32 %v2207_v12, %v191_v16 }
 0x105   :  { %v209_v20 = vmul.f32 0.01, %v192_v17 }
 0x107   :  { %v225_v21 = vmax.f32 %v192_v17, %v209_v20 }
 0x109   :  { %v233_v22 = vpack.c.bf16 %v225_v21, %v224_v19 }
 0x10b   :  { %1916 = vmatmul.msk.bf16.gmra.mxu1 %vm252_vm1, %v233_v22 }
 0x118   :  { %v286_v23 = vpop.f32.mrf.mxu1 }
 0x119   :  { %v287_v25 = vadd.f32 %v2242_v24, %v286_v23 }
 0x11b   :  { %v326_v26 = vmul.f32 0.01, %v287_v25 }
 0x11d   :  { %v342_v29 = vmax.f32 %v287_v25, %v326_v26 }
 0x120   :  { %v288_v12 = vpop.f32.mrf.mxu1 }
 0x121   :  { %v289_v27 = vadd.f32 %v2242_v24, %v288_v12 }
 0x123   :  { %v327_v28 = vmul.f32 0.01, %v289_v27 }
 0x125   :  { %v343_v30 = vmax.f32 %v289_v27, %v327_v28 }
 0x127   :  { %v358_v31 = vpack.c.bf16 %v343_v30, %v342_v29  ;;  %v2035_v29 = vld [vmem:[%s2803_s1 + $0x38] sm:$0xff] }
 0x128   :  { %v291_v32 = vpop.f32.mrf.mxu1  ;;  %545 = vmatpush.bf16.msra.mxu3 %v2035_v29 }
 0x129   :  { %1925 = vmatmul.msk.bf16.vlgmr.msra.gmra.mxu2 %vm252_vm1, %v358_v31  ;;  %v292_v33 = vadd.f32 %v2242_v24, %v291_v32 }
 0x12b   :  { %v328_v35 = vmul.f32 0.01, %v292_v33 }
 0x12d   :  { %v344_v38 = vmax.f32 %v292_v33, %v328_v35  ;;  %v2034_v33 = vld [vmem:[%s2803_s1 + $0x30] sm:$0xff] }
 0x12e   :  { %546 = vmatpush.bf16.msra.mxu3 %v2034_v33 }
 0x130   :  { %v293_v34 = vpop.f32.mrf.mxu1 }
 0x131   :  { %v294_v36 = vadd.f32 %v2242_v24, %v293_v34 }
 0x133   :  { %v329_v37 = vmul.f32 0.01, %v294_v36 }
 0x135   :  { %v345_v39 = vmax.f32 %v294_v36, %v329_v37 }
 0x137   :  { %v359_v40 = vpack.c.bf16 %v345_v39, %v344_v38 }
 0x138   :  { %v296_v41 = vpop.f32.mrf.mxu1 }
 0x139   :  { %1926 = vmatmul.msk.bf16.gmra.mxu2 %vm252_vm1, %v359_v40  ;;  %v297_v42 = vadd.f32 %v2242_v24, %v296_v41 }
 0x13b   :  { %v330_v44 = vmul.f32 0.01, %v297_v42 }
 0x13d   :  { %v346_v47 = vmax.f32 %v297_v42, %v330_v44 }
 0x140   :  { %v298_v43 = vpop.f32.mrf.mxu1 }
 0x141   :  { %v299_v45 = vadd.f32 %v2242_v24, %v298_v43 }
 0x143   :  { %v331_v46 = vmul.f32 0.01, %v299_v45 }
 0x145   :  { %v347_v48 = vmax.f32 %v299_v45, %v331_v46 }
 0x147   :  { %v360_v49 = vpack.c.bf16 %v347_v48, %v346_v47 }
 0x148   :  { %v301_v50 = vpop.f32.mrf.mxu1 }
 0x149   :  { %1927 = vmatmul.msk.bf16.gmra.mxu2 %vm252_vm1, %v360_v49  ;;  %v302_v51 = vadd.f32 %v2242_v24, %v301_v50 }
 0x14b   :  { %v332_v53 = vmul.f32 0.01, %v302_v51 }
 0x14d   :  { %v348_v56 = vmax.f32 %v302_v51, %v332_v53 }
 0x150   :  { %v303_v52 = vpop.f32.mrf.mxu1 }
 0x151   :  { %v304_v54 = vadd.f32 %v2242_v24, %v303_v52 }
 0x153   :  { %v333_v55 = vmul.f32 0.01, %v304_v54 }
 0x155   :  { %v349_v57 = vmax.f32 %v304_v54, %v333_v55 }
 0x157   :  { %v361_v58 = vpack.c.bf16 %v349_v57, %v348_v56 }
 0x158   :  { %v306_v59 = vpop.f32.mrf.mxu1 }
 0x159   :  { %1928 = vmatmul.msk.bf16.gmra.mxu2 %vm252_vm1, %v361_v58  ;;  %v307_v60 = vadd.f32 %v2242_v24, %v306_v59 }
 0x15b   :  { %v334_v62 = vmul.f32 0.01, %v307_v60 }
 0x15d   :  { %v350_v1 = vmax.f32 %v307_v60, %v334_v62  ;;  %v704_v62 = vlaneseq }
 0x160   :  { %v308_v61 = vpop.f32.mrf.mxu1 }
 0x161   :  { %v309_v63 = vadd.f32 %v2242_v24, %v308_v61 }
 0x163   :  { %v335_v0 = vmul.f32 0.01, %v309_v63 }
 0x165   :  { %v351_v2 = vmax.f32 %v309_v63, %v335_v0  ;;  %v705_v63 = vshrl.u32 %v704_v62, 7 }
 0x167   :  { %v362_v3 = vpack.c.bf16 %v351_v2, %v350_v1  ;;  %2059 = vset.pattern.permute.xlu0 %v705_v63  ;;  %2058 = vset.pattern.permute.xlu2 %v705_v63  ;;  %v2289_v1 = vand.u32 127, %v704_v62 }
 0x168   :  { %v311_v4 = vpop.f32.mrf.mxu1  ;;  %2057 = vset.pattern.permute.xlu1 %v705_v63 }
 0x169   :  { %1929 = vmatmul.msk.bf16.gmra.mxu2 %vm252_vm1, %v362_v3  ;;  %v312_v5 = vadd.f32 %v2242_v24, %v311_v4  ;;  %vm708_vm2 = vcmp.eq.s32.totalorder %v705_v63, %v2289_v1  ;;  %v2151_v3 = vmov 0.0  }
 0x16a   :  { %v2292_v4 = vsel %vm708_vm2, -1e+09, %v2151_v3 }
 0x16b   :  { %v336_v7 = vmul.f32 0.01, %v312_v5 }
 0x16d   :  { %v352_v10 = vmax.f32 %v312_v5, %v336_v7  ;;  %v725_v7 = vperm.slane %v2292_v4, 2 }
 0x16f   :  { %730 = vperm.xlu0 %2059, %v725_v7  }
 0x170   :  { %v313_v6 = vpop.f32.mrf.mxu1 }
 0x171   :  { %v314_v8 = vadd.f32 %v2242_v24, %v313_v6 }
 0x173   :  { %v337_v9 = vmul.f32 0.01, %v314_v8 }
 0x175   :  { %v353_v11 = vmax.f32 %v314_v8, %v337_v9 }
 0x177   :  { %v363_v13 = vpack.c.bf16 %v353_v11, %v352_v10 }
 0x178   :  { %v316_v14 = vpop.f32.mrf.mxu1 }
 0x179   :  { %1930 = vmatmul.msk.bf16.gmra.mxu2 %vm252_vm1, %v363_v13  ;;  %v317_v15 = vadd.f32 %v2242_v24, %v316_v14  ;;  %v732_v14 = vperm.slane %v2292_v4, 3 }
 0x17b   :  { %v338_v17 = vmul.f32 0.01, %v317_v15  ;;  %737 = vperm.xlu0 %2059, %v732_v14  }
 0x17d   :  { %v354_v20 = vmax.f32 %v317_v15, %v338_v17 }
 0x180   :  { %v318_v16 = vpop.f32.mrf.mxu1 }
 0x181   :  { %v319_v18 = vadd.f32 %v2242_v24, %v318_v16 }
 0x183   :  { %v339_v19 = vmul.f32 0.01, %v319_v18 }
 0x185   :  { %v355_v21 = vmax.f32 %v319_v18, %v339_v19  ;;  %v739_v19 = vperm.slane %v2292_v4, 4 }
 0x187   :  { %v364_v22 = vpack.c.bf16 %v355_v21, %v354_v20  ;;  %744 = vperm.xlu0 %2059, %v739_v19  }
 0x188   :  { %v321_v23 = vpop.f32.mrf.mxu1 }
 0x189   :  { %1931 = vmatmul.msk.bf16.gmra.mxu2 %vm252_vm1, %v364_v22  ;;  %v322_v25 = vadd.f32 %v2242_v24, %v321_v23 }
 0x18b   :  { %v340_v26 = vmul.f32 0.01, %v322_v25 }
 0x18d   :  { %v356_v30 = vmax.f32 %v322_v25, %v340_v26 }
 0x190   :  { %v323_v12 = vpop.f32.mrf.mxu1 }
 0x191   :  { %v324_v27 = vadd.f32 %v2242_v24, %v323_v12  ;;  %v2277_v24 = vld [vmem:[%s2805_s3 + $0x2] ss:$0 sm:$0xff]  ;;  %v760_v12 = vperm.slane %v2292_v4, 7 }
 0x193   :  { %v341_v28 = vmul.f32 0.01, %v324_v27  ;;  %765 = vperm.xlu0 %2059, %v760_v12  }
 0x195   :  { %v357_v31 = vmax.f32 %v324_v27, %v341_v28 }
 0x197   :  { %v365_v32 = vpack.c.bf16 %v357_v31, %v356_v30  ;;  %v718_v31 = vperm.slane %v2292_v4, 1 }
 0x199   :  { %1932 = vmatmul.msk.bf16.gmra.mxu2 %vm252_vm1, %v365_v32  ;;  %723 = vperm.xlu2 %2058, %v718_v31  }
 0x1ac   :  { %v417_v34 = vpop.f32.mrf.mxu2 }
 0x1ad   :  { %v418_v35 = vadd.f32 %v2277_v24, %v417_v34 }
 0x1af   :  { %v457_v37 = vmul.f32 0.01, %v418_v35 }
 0x1b1   :  { %v473_v40 = vmax.f32 %v418_v35, %v457_v37 }
 0x1b4   :  { %v419_v36 = vpop.f32.mrf.mxu2 }
 0x1b5   :  { %v420_v38 = vadd.f32 %v2277_v24, %v419_v36  ;;  %v746_v36 = vperm.slane %v2292_v4, 5 }
 0x1b7   :  { %v458_v39 = vmul.f32 0.01, %v420_v38  ;;  %751 = vperm.xlu2 %2058, %v746_v36  }
 0x1b9   :  { %v474_v41 = vmax.f32 %v420_v38, %v458_v39 }
 0x1bb   :  { %v489_v42 = vpack.c.bf16 %v474_v41, %v473_v40 }
 0x1bc   :  { %v422_v43 = vpop.f32.mrf.mxu2 }
 0x1bd   :  { %1941 = vmatmul.msk.bf16.vlgmr.msra.gmra.mxu3 %vm252_vm1, %v489_v42  ;;  %v423_v44 = vadd.f32 %v2277_v24, %v422_v43 }
 0x1bf   :  { %v459_v46 = vmul.f32 0.01, %v423_v44 }
 0x1c1   :  { %v475_v49 = vmax.f32 %v423_v44, %v459_v46 }
 0x1c4   :  { %v424_v45 = vpop.f32.mrf.mxu2 }
 0x1c5   :  { %v425_v47 = vadd.f32 %v2277_v24, %v424_v45 }
 0x1c7   :  { %v460_v48 = vmul.f32 0.01, %v425_v47 }
 0x1c9   :  { %v476_v50 = vmax.f32 %v425_v47, %v460_v48 }
 0x1cb   :  { %v490_v51 = vpack.c.bf16 %v476_v50, %v475_v49 }
 0x1cc   :  { %v427_v52 = vpop.f32.mrf.mxu2 }
 0x1cd   :  { %1942 = vmatmul.msk.bf16.gmra.mxu3 %vm252_vm1, %v490_v51  ;;  %v428_v53 = vadd.f32 %v2277_v24, %v427_v52 }
 0x1cf   :  { %v461_v55 = vmul.f32 0.01, %v428_v53 }
 0x1d1   :  { %v477_v58 = vmax.f32 %v428_v53, %v461_v55  ;;  %v2318_v55 = vld [vmem:[%s2805_s3 + $0x3] ss:$0 sm:$0xff] }
 0x1d4   :  { %v429_v54 = vpop.f32.mrf.mxu2 }
 0x1d5   :  { %v430_v56 = vadd.f32 %v2277_v24, %v429_v54  ;;  %v711_v54 = vperm.slane %v2292_v4, 0 }
 0x1d7   :  { %v462_v57 = vmul.f32 0.01, %v430_v56  ;;  %716 = vperm.xlu1 %2057, %v711_v54  }
 0x1d9   :  { %v478_v59 = vmax.f32 %v430_v56, %v462_v57  ;;  %v753_v56 = vperm.slane %v2292_v4, 6 }
 0x1db   :  { %v491_v60 = vpack.c.bf16 %v478_v59, %v477_v58  ;;  %v2325_v59 = vld [vmem:[%s2805_s3 + $0x4] ss:$0 sm:$0xff] }
 0x1dc   :  { %v432_v61 = vpop.f32.mrf.mxu2 }
 0x1dd   :  { %1943 = vmatmul.msk.bf16.gmra.mxu3 %vm252_vm1, %v491_v60  ;;  %v433_v0 = vadd.f32 %v2277_v24, %v432_v61 }
 0x1df   :  { %v463_v5 = vmul.f32 0.01, %v433_v0  ;;  %758 = vperm.xlu1 %2057, %v753_v56  }
 0x1e1   :  { %v479_v9 = vmax.f32 %v433_v0, %v463_v5 }
 0x1e4   :  { %v434_v2 = vpop.f32.mrf.mxu2 }
 0x1e5   :  { %v435_v6 = vadd.f32 %v2277_v24, %v434_v2 }
 0x1e7   :  { %v464_v8 = vmul.f32 0.01, %v435_v6 }
 0x1e9   :  { %v480_v10 = vmax.f32 %v435_v6, %v464_v8 }
 0x1eb   :  { %v492_v11 = vpack.c.bf16 %v480_v10, %v479_v9 }
 0x1ec   :  { %v437_v13 = vpop.f32.mrf.mxu2 }
 0x1ed   :  { %1944 = vmatmul.msk.bf16.gmra.mxu3 %vm252_vm1, %v492_v11  ;;  %v438_v15 = vadd.f32 %v2277_v24, %v437_v13 }
 0x1ef   :  { %v465_v17 = vmul.f32 0.01, %v438_v15 }
 0x1f1   :  { %v481_v21 = vmax.f32 %v438_v15, %v465_v17 }
 0x1f4   :  { %v439_v16 = vpop.f32.mrf.mxu2 }
 0x1f5   :  { %v440_v18 = vadd.f32 %v2277_v24, %v439_v16 }
 0x1f7   :  { %v466_v20 = vmul.f32 0.01, %v440_v18 }
 0x1f9   :  { %v482_v22 = vmax.f32 %v440_v18, %v466_v20 }
 0x1fb   :  { %v493_v23 = vpack.c.bf16 %v482_v22, %v481_v21 }
 0x1fc   :  { %v442_v25 = vpop.f32.mrf.mxu2 }
 0x1fd   :  { %1945 = vmatmul.msk.bf16.gmra.mxu3 %vm252_vm1, %v493_v23  ;;  %v443_v26 = vadd.f32 %v2277_v24, %v442_v25 }
 0x1ff   :  { %v467_v28 = vmul.f32 0.01, %v443_v26 }
 0x201   :  { %v483_v32 = vmax.f32 %v443_v26, %v467_v28 }
 0x204   :  { %v444_v27 = vpop.f32.mrf.mxu2 }
 0x205   :  { %v445_v29 = vadd.f32 %v2277_v24, %v444_v27 }
 0x207   :  { %v468_v30 = vmul.f32 0.01, %v445_v29 }
 0x209   :  { %v484_v33 = vmax.f32 %v445_v29, %v468_v30 }
 0x20b   :  { %v494_v34 = vpack.c.bf16 %v484_v33, %v483_v32 }
 0x20c   :  { %v447_v35 = vpop.f32.mrf.mxu2 }
 0x20d   :  { %1946 = vmatmul.msk.bf16.gmra.mxu3 %vm252_vm1, %v494_v34  ;;  %v448_v37 = vadd.f32 %v2277_v24, %v447_v35 }
 0x20f   :  { %v469_v39 = vmul.f32 0.01, %v448_v37 }
 0x211   :  { %v485_v42 = vmax.f32 %v448_v37, %v469_v39 }
 0x214   :  { %v449_v38 = vpop.f32.mrf.mxu2 }
 0x215   :  { %v450_v40 = vadd.f32 %v2277_v24, %v449_v38 }
 0x217   :  { %v470_v41 = vmul.f32 0.01, %v450_v40 }
 0x219   :  { %v486_v43 = vmax.f32 %v450_v40, %v470_v41 }
 0x21b   :  { %v495_v44 = vpack.c.bf16 %v486_v43, %v485_v42 }
 0x21c   :  { %v452_v45 = vpop.f32.mrf.mxu2 }
 0x21d   :  { %1947 = vmatmul.msk.bf16.gmra.mxu3 %vm252_vm1, %v495_v44  ;;  %v453_v46 = vadd.f32 %v2277_v24, %v452_v45 }
 0x21f   :  { %v471_v48 = vmul.f32 0.01, %v453_v46 }
 0x221   :  { %v487_v51 = vmax.f32 %v453_v46, %v471_v48 }
 0x224   :  { %v454_v47 = vpop.f32.mrf.mxu2 }
 0x225   :  { %v455_v49 = vadd.f32 %v2277_v24, %v454_v47 }
 0x227   :  { %v472_v50 = vmul.f32 0.01, %v455_v49 }
 0x229   :  { %v488_v52 = vmax.f32 %v455_v49, %v472_v50 }
 0x22b   :  { %v496_v53 = vpack.c.bf16 %v488_v52, %v487_v51 }
 0x22d   :  { %1948 = vmatmul.msk.bf16.gmra.mxu3 %vm252_vm1, %v496_v53 }
 0x240   :  { %v548_v57 = vpop.f32.mrf.mxu3 }
 0x241   :  { %v549_v24 = vadd.f32 %v2318_v55, %v548_v57 }
 0x243   :  { %v588_v58 = vmul.f32 0.01, %v549_v24 }
 0x245   :  { %v604_v60 = vmax.f32 %v549_v24, %v588_v58 }
 0x247   :  { %v623_v61 = vmul.f32 %v2325_v59, %v604_v60  ;;  %v2357_v60 = vpop.permute.xlu0 %730 }
 0x248   :  { %v550_v62 = vpop.f32.mrf.mxu3 }
 0x249   :  { %v551_v63 = vadd.f32 %v2318_v55, %v550_v62  ;;  %v639_v0 = vsel %vm252_vm1, %v623_v61, 0.0 }
 0x24a   :  { %640 = vadd.xlane.f32.xlu0 %v639_v0 }
 0x24b   :  { %v589_v2 = vmul.f32 0.01, %v551_v63 }
 0x24d   :  { %v605_v3 = vmax.f32 %v551_v63, %v589_v2 }
 0x24f   :  { %v624_v4 = vmul.f32 %v2325_v59, %v605_v3 }
 0x250   :  { %v553_v5 = vpop.f32.mrf.mxu3 }
 0x251   :  { %v554_v6 = vadd.f32 %v2318_v55, %v553_v5  ;;  %v642_v7 = vsel %vm252_vm1, %v624_v4, 0.0  ;;  %v2363_v5 = vpop.permute.xlu0 %737 }
 0x252   :  { %643 = vadd.xlane.f32.xlu0 %v642_v7 }
 0x253   :  { %v590_v8 = vmul.f32 0.01, %v554_v6 }
 0x255   :  { %v606_v9 = vmax.f32 %v554_v6, %v590_v8 }
 0x257   :  { %v625_v10 = vmul.f32 %v2325_v59, %v606_v9 }
 0x258   :  { %v555_v11 = vpop.f32.mrf.mxu3 }
 0x259   :  { %v556_v13 = vadd.f32 %v2318_v55, %v555_v11  ;;  %v645_v14 = vsel %vm252_vm1, %v625_v10, 0.0  ;;  %v2152_v10 = vmov 0  }
 0x25a   :  { %646 = vadd.xlane.f32.xlu2 %v645_v14  ;;  %2060 = vset.pattern.permute.xlu0 %v2152_v10 }
 0x25b   :  { %v591_v15 = vmul.f32 0.01, %v556_v13  ;;  %2061 = vset.pattern.permute.xlu2 %v2152_v10  ;;  %2062 = vset.pattern.permute.xlu1 %v2152_v10 }
 0x25d   :  { %v607_v16 = vmax.f32 %v556_v13, %v591_v15 }
 0x25f   :  { %v626_v17 = vmul.f32 %v2325_v59, %v607_v16 }
 0x260   :  { %v558_v18 = vpop.f32.mrf.mxu3 }
 0x261   :  { %v559_v19 = vadd.f32 %v2318_v55, %v558_v18  ;;  %v648_v20 = vsel %vm252_vm1, %v626_v17, 0.0  ;;  %v2370_v17 = vpop.permute.xlu0 %744 }
 0x262   :  { %649 = vadd.xlane.f32.xlu0 %v648_v20 }
 0x263   :  { %v592_v21 = vmul.f32 0.01, %v559_v19 }
 0x265   :  { %v608_v22 = vmax.f32 %v559_v19, %v592_v21 }
 0x267   :  { %v627_v23 = vmul.f32 %v2325_v59, %v608_v22 }
 0x268   :  { %v560_v25 = vpop.f32.mrf.mxu3 }
 0x269   :  { %v561_v12 = vadd.f32 %v2318_v55, %v560_v25  ;;  %v651_v26 = vsel %vm252_vm1, %v627_v23, 0.0 }
 0x26a   :  { %652 = vadd.xlane.f32.xlu2 %v651_v26 }
 0x26b   :  { %v593_v27 = vmul.f32 0.01, %v561_v12 }
 0x26d   :  { %v609_v28 = vmax.f32 %v561_v12, %v593_v27  ;;  %v2375_v12 = vpop.permute.xlu0 %765 }
 0x26f   :  { %v628_v29 = vmul.f32 %v2325_v59, %v609_v28 }
 0x270   :  { %v563_v30 = vpop.f32.mrf.mxu3 }
 0x271   :  { %v564_v31 = vadd.f32 %v2318_v55, %v563_v30  ;;  %v654_v32 = vsel %vm252_vm1, %v628_v29, 0.0 }
 0x272   :  { %655 = vadd.xlane.f32.xlu0 %v654_v32 }
 0x273   :  { %v594_v33 = vmul.f32 0.01, %v564_v31 }
 0x275   :  { %v610_v34 = vmax.f32 %v564_v31, %v594_v33  ;;  %v724_v31 = vpop.permute.xlu2 %723  ;;  %v2383_v33 = vld [vmem:[%s2805_s3 + $0x5] ss:$0 sm:$0xff] }
 0x277   :  { %v629_v35 = vmul.f32 %v2325_v59, %v610_v34 }
 0x278   :  { %v565_v36 = vpop.f32.mrf.mxu3 }
 0x279   :  { %v566_v37 = vadd.f32 %v2318_v55, %v565_v36  ;;  %v657_v38 = vsel %vm252_vm1, %v629_v35, 0.0 }
 0x27a   :  { %658 = vadd.xlane.f32.xlu2 %v657_v38  ;;  %v717_v38 = vpop.permute.xlu1 %716 }
 0x27b   :  { %v595_v39 = vmul.f32 0.01, %v566_v37 }
 0x27d   :  { %v611_v40 = vmax.f32 %v566_v37, %v595_v39 }
 0x27f   :  { %v630_v41 = vmul.f32 %v2325_v59, %v611_v40  ;;  %v752_v40 = vpop.permute.xlu2 %751 }
 0x280   :  { %v568_v42 = vpop.f32.mrf.mxu3 }
 0x281   :  { %v569_v43 = vadd.f32 %v2318_v55, %v568_v42  ;;  %v660_v44 = vsel %vm252_vm1, %v630_v41, 0.0 }
 0x282   :  { %661 = vadd.xlane.f32.xlu2 %v660_v44 }
 0x283   :  { %v596_v45 = vmul.f32 0.01, %v569_v43 }
 0x285   :  { %v612_v46 = vmax.f32 %v569_v43, %v596_v45 }
 0x287   :  { %v631_v47 = vmul.f32 %v2325_v59, %v612_v46 }
 0x288   :  { %v570_v48 = vpop.f32.mrf.mxu3 }
 0x289   :  { %v571_v49 = vadd.f32 %v2318_v55, %v570_v48  ;;  %v663_v50 = vsel %vm252_vm1, %v631_v47, 0.0 }
 0x28a   :  { %664 = vadd.xlane.f32.xlu1 %v663_v50 }
 0x28b   :  { %v597_v51 = vmul.f32 0.01, %v571_v49 }
 0x28d   :  { %v613_v52 = vmax.f32 %v571_v49, %v597_v51 }
 0x28f   :  { %v632_v53 = vmul.f32 %v2325_v59, %v613_v52 }
 0x290   :  { %v573_v54 = vpop.f32.mrf.mxu3 }
 0x291   :  { %v574_v56 = vadd.f32 %v2318_v55, %v573_v54  ;;  %v666_v57 = vsel %vm252_vm1, %v632_v53, 0.0 }
 0x292   :  { %667 = vadd.xlane.f32.xlu1 %v666_v57 }
 0x293   :  { %v598_v24 = vmul.f32 0.01, %v574_v56 }
 0x295   :  { %v614_v58 = vmax.f32 %v574_v56, %v598_v24  ;;  %v759_v24 = vpop.permute.xlu1 %758 }
 0x297   :  { %v633_v61 = vmul.f32 %v2325_v59, %v614_v58 }
 0x298   :  { %v575_v62 = vpop.f32.mrf.mxu3 }
 0x299   :  { %v576_v63 = vadd.f32 %v2318_v55, %v575_v62  ;;  %v669_v0 = vsel %vm252_vm1, %v633_v61, 0.0 }
 0x29a   :  { %670 = vadd.xlane.f32.xlu2 %v669_v0 }
 0x29b   :  { %v599_v2 = vmul.f32 0.01, %v576_v63 }
 0x29d   :  { %v615_v3 = vmax.f32 %v576_v63, %v599_v2 }
 0x29f   :  { %v634_v4 = vmul.f32 %v2325_v59, %v615_v3 }
 0x2a0   :  { %v578_v6 = vpop.f32.mrf.mxu3 }
 0x2a1   :  { %v579_v7 = vadd.f32 %v2318_v55, %v578_v6  ;;  %v672_v8 = vsel %vm252_vm1, %v634_v4, 0.0 }
 0x2a2   :  { %673 = vadd.xlane.f32.xlu1 %v672_v8 }
 0x2a3   :  { %v600_v9 = vmul.f32 0.01, %v579_v7 }
 0x2a5   :  { %v616_v11 = vmax.f32 %v579_v7, %v600_v9 }
 0x2a7   :  { %v635_v13 = vmul.f32 %v2325_v59, %v616_v11 }
 0x2a8   :  { %v580_v14 = vpop.f32.mrf.mxu3 }
 0x2a9   :  { %v581_v15 = vadd.f32 %v2318_v55, %v580_v14  ;;  %v675_v16 = vsel %vm252_vm1, %v635_v13, 0.0 }
 0x2aa   :  { %676 = vadd.xlane.f32.xlu0 %v675_v16 }
 0x2ab   :  { %v601_v18 = vmul.f32 0.01, %v581_v15 }
 0x2ad   :  { %v617_v19 = vmax.f32 %v581_v15, %v601_v18 }
 0x2af   :  { %v636_v20 = vmul.f32 %v2325_v59, %v617_v19 }
 0x2b0   :  { %v583_v21 = vpop.f32.mrf.mxu3 }
 0x2b1   :  { %v584_v22 = vadd.f32 %v2318_v55, %v583_v21  ;;  %v678_v23 = vsel %vm252_vm1, %v636_v20, 0.0 }
 0x2b2   :  { %679 = vadd.xlane.f32.xlu0 %v678_v23 }
 0x2b3   :  { %v602_v25 = vmul.f32 0.01, %v584_v22 }
 0x2b5   :  { %v618_v26 = vmax.f32 %v584_v22, %v602_v25 }
 0x2b7   :  { %v637_v27 = vmul.f32 %v2325_v59, %v618_v26 }
 0x2b8   :  { %v585_v28 = vpop.f32.mrf.mxu3 }
 0x2b9   :  { %v586_v29 = vadd.f32 %v2318_v55, %v585_v28  ;;  %v681_v30 = vsel %vm252_vm1, %v637_v27, 0.0 }
 0x2ba   :  { %682 = vadd.xlane.f32.xlu1 %v681_v30 }
 0x2bb   :  { %v603_v32 = vmul.f32 0.01, %v586_v29 }
 0x2bd   :  { %v619_v34 = vmax.f32 %v586_v29, %v603_v32  ;;  %v641_v35 = vpop.xlane.xlu0 %640 }
 0x2be   :  { %v688_v37 = vadd.f32 %v2383_v33, %v641_v35 }
 0x2bf   :  { %v638_v36 = vmul.f32 %v2325_v59, %v619_v34 }
 0x2c0   :  { %v2388_v55 = vadd.f32 %v717_v38, %v688_v37 }
 0x2c1   :  { %v684_v39 = vsel %vm252_vm1, %v638_v36, 0.0 }
 0x2c2   :  { %685 = vadd.xlane.f32.xlu1 %v684_v39 }
 0x2c5   :  { %v644_v41 = vpop.xlane.xlu0 %643 }
 0x2c6   :  { %v689_v42 = vadd.f32 %v2383_v33, %v644_v41  ;;  %808 = vperm.xlu0 %2060, %v2388_v55  }
 0x2c8   :  { %v2392_v43 = vadd.f32 %v724_v31, %v689_v42 }
 0x2ca   :  { %811 = vperm.xlu2 %2061, %v2392_v43  }
 0x2cd   :  { %v647_v44 = vpop.xlane.xlu2 %646 }
 0x2ce   :  { %v690_v59 = vadd.f32 %v2383_v33, %v647_v44 }
 0x2d0   :  { %v2397_v45 = vadd.f32 %v2357_v60, %v690_v59 }
 0x2d2   :  { %814 = vperm.xlu2 %2061, %v2397_v45  }
 0x2d5   :  { %v650_v46 = vpop.xlane.xlu0 %649 }
 0x2d6   :  { %v691_v47 = vadd.f32 %v2383_v33, %v650_v46 }
 0x2d8   :  { %v2402_v48 = vadd.f32 %v2363_v5, %v691_v47 }
 0x2da   :  { %817 = vperm.xlu0 %2060, %v2402_v48  }
 0x2dd   :  { %v653_v49 = vpop.xlane.xlu2 %652 }
 0x2de   :  { %v692_v50 = vadd.f32 %v2383_v33, %v653_v49 }
 0x2e0   :  { %v2407_v51 = vadd.f32 %v2370_v17, %v692_v50 }
 0x2e2   :  { %820 = vperm.xlu1 %2062, %v2407_v51  }
 0x2e5   :  { %v656_v52 = vpop.xlane.xlu0 %655 }
 0x2e6   :  { %v693_v53 = vadd.f32 %v2383_v33, %v656_v52 }
 0x2e8   :  { %v2411_v54 = vadd.f32 %v752_v40, %v693_v53 }
 0x2ea   :  { %823 = vperm.xlu2 %2061, %v2411_v54  }
 0x2ed   :  { %v659_v56 = vpop.xlane.xlu2 %658 }
 0x2ee   :  { %v694_v57 = vadd.f32 %v2383_v33, %v659_v56 }
 0x2f0   :  { %v2415_v58 = vadd.f32 %v759_v24, %v694_v57 }
 0x2f2   :  { %826 = vperm.xlu0 %2060, %v2415_v58  }
 0x2f5   :  { %v662_v0 = vpop.xlane.xlu2 %661 }
 0x2fd   :  { %v665_v61 = vpop.xlane.xlu1 %664 }
 0x2fe   :  { %v696_v62 = vadd.f32 %v2383_v33, %v665_v61 }
 0x300   :  { %v2419_v63 = vadd.f32 %v717_v38, %v696_v62 }
 0x302   :  { %832 = vperm.xlu1 %2062, %v2419_v63  }
 0x305   :  { %v668_v2 = vpop.xlane.xlu1 %667 }
 0x306   :  { %v697_v3 = vadd.f32 %v2383_v33, %v668_v2 }
 0x308   :  { %v2423_v4 = vadd.f32 %v724_v31, %v697_v3 }
 0x30a   :  { %835 = vperm.xlu0 %2060, %v2423_v4  }
 0x30d   :  { %v671_v6 = vpop.xlane.xlu2 %670 }
 0x30e   :  { %v698_v7 = vadd.f32 %v2383_v33, %v671_v6 }
 0x310   :  { %v2428_v8 = vadd.f32 %v2357_v60, %v698_v7 }
 0x312   :  { %838 = vperm.xlu1 %2062, %v2428_v8  }
 0x315   :  { %v674_v9 = vpop.xlane.xlu1 %673 }
 0x316   :  { %v699_v10 = vadd.f32 %v2383_v33, %v674_v9 }
 0x318   :  { %v2433_v11 = vadd.f32 %v2363_v5, %v699_v10  ;;  %v695_v5 = vadd.f32 %v2383_v33, %v662_v0 }
 0x31a   :  { %841 = vperm.xlu2 %2061, %v2433_v11   ;;  %v2448_v21 = vadd.f32 %v2375_v12, %v695_v5 }
 0x31d   :  { %v677_v13 = vpop.xlane.xlu0 %676 }
 0x31e   :  { %v700_v14 = vadd.f32 %v2383_v33, %v677_v13 }
 0x320   :  { %v2438_v15 = vadd.f32 %v2370_v17, %v700_v14 }
 0x322   :  { %844 = vperm.xlu0 %2060, %v2438_v15  }
 0x324   :  { %v812_v28 = vpop.permute.xlu2 %811 }
 0x325   :  { %v680_v60 = vpop.xlane.xlu0 %679  ;;  %v856_v37 = vperm.slane %v812_v28, %v2289_v1 }
 0x326   :  { %v701_v16 = vadd.f32 %v2383_v33, %v680_v60 }
 0x328   :  { %v2442_v18 = vadd.f32 %v752_v40, %v701_v16 }
 0x32a   :  { %847 = vperm.xlu1 %2062, %v2442_v18  }
 0x32c   :  { %v815_v31 = vpop.permute.xlu2 %814 }
 0x32d   :  { %v683_v19 = vpop.xlane.xlu1 %682  ;;  %v857_v40 = vperm.slane %v815_v31, %v2289_v1 }
 0x32e   :  { %v702_v20 = vadd.f32 %v2383_v33, %v683_v19 }
 0x330   :  { %v2450_v22 = vadd.f32 %v759_v24, %v702_v20 }
 0x332   :  { %850 = vperm.xlu2 %2061, %v2450_v22   ;;  %829 = vperm.xlu1 %2062, %v2448_v21  }
 0x335   :  { %v686_v17 = vpop.xlane.xlu1 %685 }
 0x336   :  { %v703_v23 = vadd.f32 %v2383_v33, %v686_v17 }
 0x338   :  { %v2456_v25 = vadd.f32 %v2375_v12, %v703_v23  ;;  %v809_v26 = vpop.permute.xlu0 %808 }
 0x339   :  { %v855_v35 = vperm.slane %v809_v26, %v2289_v1 }
 0x33a   :  { %853 = vperm.xlu0 %2060, %v2456_v25  }
 0x33b   :  { %v872_v12 = vsel %vm871_vm3, %v856_v37, %v855_v35 }
 0x33c   :  { %v874_v42 = vsel %vm873_vm4, %v857_v40, %v872_v12 }
 0x344   :  { %v824_v36 = vpop.permute.xlu2 %823 }
 0x345   :  { %v860_v52 = vperm.slane %v824_v36, %v2289_v1 }
 0x34c   :  { %v818_v29 = vpop.permute.xlu0 %817 }
 0x34d   :  { %v858_v39 = vperm.slane %v818_v29, %v2289_v1 }
 0x34f   :  { %v876_v44 = vsel %vm875_vm5, %v858_v39, %v874_v42 }
 0x354   :  { %v821_v27 = vpop.permute.xlu1 %820 }
 0x355   :  { %v859_v41 = vperm.slane %v821_v27, %v2289_v1 }
 0x357   :  { %v878_v47 = vsel %vm877_vm6, %v859_v41, %v876_v44 }
 0x358   :  { %v880_v62 = vsel %vm879_vm7, %v860_v52, %v878_v47 }
 0x364   :  { %v827_v32 = vpop.permute.xlu0 %826 }
 0x365   :  { %v861_v49 = vperm.slane %v827_v32, %v2289_v1 }
 0x367   :  { %v882_v3 = vsel %vm881_vm8, %v861_v49, %v880_v62 }
 0x374   :  { %v833_v30 = vpop.permute.xlu1 %832  ;;  %v842_v59 = vpop.permute.xlu2 %841 }
 0x375   :  { %v863_v53 = vperm.slane %v833_v30, %v2289_v1  ;;  %v866_v6 = vperm.slane %v842_v59, %v2289_v1 }
 0x37c   :  { %v836_v33 = vpop.permute.xlu0 %835 }
 0x37d   :  { %v864_v46 = vperm.slane %v836_v33, %v2289_v1 }
 0x37f   :  { %v885_v24 = vsel %vm871_vm3, %v864_v46, %v863_v53 }
 0x384   :  { %v839_v34 = vpop.permute.xlu1 %838 }
 0x385   :  { %v865_v50 = vperm.slane %v839_v34, %v2289_v1 }
 0x387   :  { %v886_v0 = vsel %vm873_vm4, %v865_v50, %v885_v24 }
 0x388   :  { %v887_v14 = vsel %vm875_vm5, %v866_v6, %v886_v0 }
 0x38c   :  { %v851_v13 = vpop.permute.xlu2 %850 }
 0x38d   :  { %v869_v5 = vperm.slane %v851_v13, %v2289_v1 }
 0x394   :  { %v845_v56 = vpop.permute.xlu0 %844 }
 0x395   :  { %v867_v2 = vperm.slane %v845_v56, %v2289_v1 }
 0x397   :  { %v888_v60 = vsel %vm877_vm6, %v867_v2, %v887_v14 }
 0x39c   :  { %v848_v38 = vpop.permute.xlu1 %847 }
 0x39d   :  { %v868_v7 = vperm.slane %v848_v38, %v2289_v1 }
 0x39f   :  { %v889_v16 = vsel %vm879_vm7, %v868_v7, %v888_v60 }
 0x3a0   :  { %v890_v17 = vsel %vm881_vm8, %v869_v5, %v889_v16 }
 0x3a4   :  { %v830_v57 = vpop.permute.xlu1 %829 }
 0x3a5   :  { %v862_v61 = vperm.slane %v830_v57, %v2289_v1 }
 0x3a7   :  { %v884_v9 = vsel %vm883_vm9, %v862_v61, %v882_v3 }
 0x3a8   :  { %v895_v10 = vsel %vm894_vm10, %v884_v9, -inf }
 0x3a9   :  { %896 = vmax.xlane.f32.xlu2 %v895_v10 }
 0x3ac   :  { %v854_v19 = vpop.permute.xlu0 %853 }
 0x3ad   :  { %v870_v20 = vperm.slane %v854_v19, %v2289_v1 }
 0x3af   :  { %v891_v23 = vsel %vm883_vm9, %v870_v20, %v890_v17 }
 0x3b0   :  { %v898_v26 = vsel %vm894_vm10, %v891_v23, -inf }
 0x3b1   :  { %899 = vmax.xlane.f32.xlu1 %v898_v26 }
 0x41c   :  { %v897_v27 = vpop.xlane.xlu2 %896 }
 0x41d   :  { %v908_v28 = vperm.slane %v897_v27, 5  ;;  %v903_v29 = vperm.slane %v897_v27, 0  ;;  %v906_v30 = vperm.slane %v897_v27, 3  ;;  %v904_v31 = vperm.slane %v897_v27, 1 }
 0x41e   :  { %v910_v46 = vperm.slane %v897_v27, 7  ;;  %v907_v57 = vperm.slane %v897_v27, 4 }
 0x41f   :  { %v940_v32 = vsub.f32 %v2411_v54, %v908_v28  ;;  %v935_v34 = vsub.f32 %v2388_v55, %v903_v29  ;;  %v938_v35 = vsub.f32 %v2402_v48, %v906_v30  ;;  %v936_v38 = vsub.f32 %v2392_v43, %v904_v31 }
 0x420   :  { %v905_v48 = vperm.slane %v897_v27, 2  ;;  %v942_v50 = vsub.f32 %v2448_v21, %v910_v46 }
 0x421   :  { %v961_v36 = vmul.f32 1.442695, %v940_v32  ;;  %v951_v37 = vmul.f32 1.442695, %v935_v34  ;;  %v957_v33 = vmul.f32 1.442695, %v938_v35 }
 0x422   :  { %v953_v41 = vmul.f32 1.442695, %v936_v38  ;;  %v965_v61 = vmul.f32 1.442695, %v942_v50 }
 0x423   :  { %2083 = vpow2.f32 %v961_v36 }
 0x424   :  { %v2495_v12 = vpop.xlane.xlu1 %899  ;;  %2085 = vpow2.f32 %v951_v37 }
 0x425   :  { %2087 = vpow2.f32 %v957_v33  ;;  %v916_v39 = vperm.slane %v2495_v12, 5  ;;  %v913_v40 = vperm.slane %v2495_v12, 2  ;;  %v917_v42 = vperm.slane %v2495_v12, 6 }
 0x426   :  { %2089 = vpow2.f32 %v953_v41  ;;  %v912_v14 = vperm.slane %v2495_v12, 1  ;;  %v914_v5 = vperm.slane %v2495_v12, 3  ;;  %v915_v17 = vperm.slane %v2495_v12, 4 }
 0x427   :  { %v948_v54 = vsub.f32 %v2442_v18, %v916_v39  ;;  %v945_v55 = vsub.f32 %v2428_v8, %v913_v40  ;;  %v937_v8 = vsub.f32 %v2397_v45, %v905_v48  ;;  %v949_v18 = vsub.f32 %v2450_v22, %v917_v42 }
 0x428   :  { %v939_v45 = vsub.f32 %v2407_v51, %v907_v57  ;;  %v909_v22 = vperm.slane %v897_v27, 6  ;;  %v911_v51 = vperm.slane %v2495_v12, 0  ;;  %v918_v27 = vperm.slane %v2495_v12, 7 }
 0x429   :  { %v2502_v44 = vpop.eup %2083  ;;  %v977_v43 = vmul.f32 1.442695, %v948_v54  ;;  %v971_v59 = vmul.f32 1.442695, %v945_v55  ;;  %v955_v52 = vmul.f32 1.442695, %v937_v8 }
 0x42a   :  { %v2504_v47 = vpop.eup %2085  ;;  %1015 = vperm.xlu2 %2061, %v2502_v44   ;;  %v979_v56 = vmul.f32 1.442695, %v949_v18  ;;  %v959_v21 = vmul.f32 1.442695, %v939_v45  ;;  %v941_v6 = vsub.f32 %v2415_v58, %v909_v22  ;;  %v943_v10 = vsub.f32 %v2419_v63, %v911_v51 }
 0x42b   :  { %v2507_v49 = vpop.eup %2087  ;;  %1000 = vperm.xlu0 %2060, %v2504_v47   ;;  %2091 = vpow2.f32 %v977_v43  ;;  %v944_v58 = vsub.f32 %v2423_v4, %v912_v14  ;;  %v946_v63 = vsub.f32 %v2433_v11, %v914_v5  ;;  %v947_v4 = vsub.f32 %v2438_v15, %v915_v17 }
 0x42c   :  { %1009 = vperm.xlu1 %2062, %v2507_v49   ;;  %2093 = vpow2.f32 %v971_v59  ;;  %v2514_v53 = vpop.eup %2089  ;;  %v963_v7 = vmul.f32 1.442695, %v941_v6  ;;  %v967_v13 = vmul.f32 1.442695, %v943_v10  ;;  %v950_v11 = vsub.f32 %v2456_v25, %v918_v27 }
 0x42d   :  { %2095 = vpow2.f32 %v955_v52  ;;  %v969_v16 = vmul.f32 1.442695, %v944_v58  ;;  %v973_v20 = vmul.f32 1.442695, %v946_v63  ;;  %v975_v26 = vmul.f32 1.442695, %v947_v4 }
 0x42e   :  { %2097 = vpow2.f32 %v979_v56  ;;  %v981_v29 = vmul.f32 1.442695, %v950_v11 }
 0x42f   :  { %2099 = vpow2.f32 %v965_v61 }
 0x430   :  { %2101 = vpow2.f32 %v959_v21 }
 0x431   :  { %v2516_v24 = vpop.eup %2091  ;;  %2103 = vpow2.f32 %v963_v7 }
 0x432   :  { %v2518_v62 = vpop.eup %2093  ;;  %2105 = vpow2.f32 %v967_v13 }
 0x433   :  { %1003 = vperm.xlu0 %2060, %v2514_v53   ;;  %1030 = vperm.xlu2 %2061, %v2518_v62   ;;  %v2524_v0 = vpop.eup %2095  ;;  %2107 = vpow2.f32 %v969_v16 }
 0x434   :  { %1039 = vperm.xlu1 %2062, %v2516_v24   ;;  %v2526_v2 = vpop.eup %2097  ;;  %2109 = vpow2.f32 %v973_v20 }
 0x435   :  { %v2528_v3 = vpop.eup %2099  ;;  %2111 = vpow2.f32 %v975_v26 }
 0x436   :  { %v2535_v9 = vpop.eup %2101  ;;  %2113 = vpow2.f32 %v981_v29 }
 0x437   :  { %v2540_v60 = vpop.eup %2103 }
 0x438   :  { %v2545_v19 = vpop.eup %2105 }
 0x439   :  { %v2550_v23 = vpop.eup %2107 }
 0x43a   :  { %v2555_v28 = vpop.eup %2109 }
 0x43b   :  { %1006 = vperm.xlu0 %2060, %v2524_v0   ;;  %1042 = vperm.xlu2 %2061, %v2526_v2   ;;  %v2559_v30 = vpop.eup %2111 }
 0x43c   :  { %1021 = vperm.xlu1 %2062, %v2528_v3   ;;  %v2562_v31 = vpop.eup %2113 }
 0x443   :  { %1012 = vperm.xlu0 %2060, %v2535_v9  }
 0x44b   :  { %1018 = vperm.xlu0 %2060, %v2540_v60  }
 0x453   :  { %1024 = vperm.xlu0 %2060, %v2545_v19  }
 0x45b   :  { %1027 = vperm.xlu0 %2060, %v2550_v23  }
 0x463   :  { %1033 = vperm.xlu0 %2060, %v2555_v28  }
 0x46b   :  { %1036 = vperm.xlu0 %2060, %v2559_v30  }
 0x473   :  { %1045 = vperm.xlu0 %2060, %v2562_v31  }
 0x484   :  { %v1016_v54 = vpop.permute.xlu2 %1015 }
 0x485   :  { %v1052_v43 = vperm.slane %v1016_v54, %v2289_v1 }
 0x48d   :  { %v1031_v21 = vpop.permute.xlu2 %1030 }
 0x48e   :  { %v1057_v10 = vperm.slane %v1031_v21, %v2289_v1 }
 0x495   :  { %v1043_v63 = vpop.permute.xlu2 %1042 }
 0x496   :  { %v1061_v4 = vperm.slane %v1043_v63, %v2289_v1 }
 0x49d   :  { %v1001_v15 = vpop.permute.xlu0 %1000 }
 0x49e   :  { %v1010_v34 = vpop.permute.xlu1 %1009  ;;  %v1047_v25 = vperm.slane %v1001_v15, %v2289_v1 }
 0x49f   :  { %v1050_v41 = vperm.slane %v1010_v34, %v2289_v1 }
 0x4a5   :  { %v1004_v32 = vpop.permute.xlu0 %1003 }
 0x4a6   :  { %v1040_v36 = vpop.permute.xlu1 %1039  ;;  %v1048_v37 = vperm.slane %v1004_v32, %v2289_v1 }
 0x4a7   :  { %v1060_v20 = vperm.slane %v1040_v36, %v2289_v1 }
 0x4a8   :  { %v1063_v12 = vsel %vm871_vm3, %v1048_v37, %v1047_v25 }
 0x4ad   :  { %v1007_v35 = vpop.permute.xlu0 %1006 }
 0x4ae   :  { %v1049_v33 = vperm.slane %v1007_v35, %v2289_v1  ;;  %v1022_v48 = vpop.permute.xlu1 %1021 }
 0x4af   :  { %v1054_v8 = vperm.slane %v1022_v48, %v2289_v1 }
 0x4b0   :  { %v1064_v39 = vsel %vm873_vm4, %v1049_v33, %v1063_v12 }
 0x4b1   :  { %v1065_v55 = vsel %vm875_vm5, %v1050_v41, %v1064_v39 }
 0x4b5   :  { %v1013_v38 = vpop.permute.xlu0 %1012 }
 0x4b6   :  { %v1051_v40 = vperm.slane %v1013_v38, %v2289_v1 }
 0x4b8   :  { %v1066_v42 = vsel %vm877_vm6, %v1051_v40, %v1065_v55 }
 0x4b9   :  { %v1067_v18 = vsel %vm879_vm7, %v1052_v43, %v1066_v42 }
 0x4bd   :  { %v1019_v59 = vpop.permute.xlu0 %1018 }
 0x4be   :  { %v1053_v46 = vperm.slane %v1019_v59, %v2289_v1 }
 0x4c0   :  { %v1068_v50 = vsel %vm881_vm8, %v1053_v46, %v1067_v18 }
 0x4c1   :  { %v1069_v52 = vsel %vm883_vm9, %v1054_v8, %v1068_v50 }
 0x4c2   :  { %v1079_v56 = vsel %vm894_vm10, %v1069_v52, 0.0 }
 0x4c3   :  { %1080 = vadd.xlane.f32.xlu2 %v1079_v56 }
 0x4c5   :  { %v1025_v57 = vpop.permute.xlu0 %1024 }
 0x4c6   :  { %v1055_v6 = vperm.slane %v1025_v57, %v2289_v1 }
 0x4cd   :  { %v1028_v61 = vpop.permute.xlu0 %1027 }
 0x4ce   :  { %v1056_v22 = vperm.slane %v1028_v61, %v2289_v1 }
 0x4d0   :  { %v1070_v7 = vsel %vm871_vm3, %v1056_v22, %v1055_v6 }
 0x4d1   :  { %v1071_v58 = vsel %vm873_vm4, %v1057_v10, %v1070_v7 }
 0x4d5   :  { %v1034_v45 = vpop.permute.xlu0 %1033 }
 0x4d6   :  { %v1058_v51 = vperm.slane %v1034_v45, %v2289_v1 }
 0x4d8   :  { %v1072_v16 = vsel %vm875_vm5, %v1058_v51, %v1071_v58 }
 0x4dd   :  { %v1037_v13 = vpop.permute.xlu0 %1036 }
 0x4de   :  { %v1059_v14 = vperm.slane %v1037_v13, %v2289_v1 }
 0x4e0   :  { %v1073_v5 = vsel %vm877_vm6, %v1059_v14, %v1072_v16 }
 0x4e1   :  { %v1074_v17 = vsel %vm879_vm7, %v1060_v20, %v1073_v5 }
 0x4e2   :  { %v1075_v11 = vsel %vm881_vm8, %v1061_v4, %v1074_v17 }
 0x4e5   :  { %v1046_v26 = vpop.permute.xlu0 %1045 }
 0x4e6   :  { %v1062_v27 = vperm.slane %v1046_v26, %v2289_v1 }
 0x4e8   :  { %v1076_v29 = vsel %vm883_vm9, %v1062_v27, %v1075_v11 }
 0x4e9   :  { %v1082_v15 = vsel %vm894_vm10, %v1076_v29, 0.0 }
 0x4ea   :  { %1083 = vadd.xlane.f32.xlu1 %v1082_v15 }
 0x536   :  { %v1081_v32 = vpop.xlane.xlu2 %1080 }
 0x537   :  { %2115 = vrcp.f32 %v1081_v32  ;;  %v1096_v36 = vand.u32 2147483648, %v1081_v32  ;;  %v1094_v25 = vand.u32 2147483647, %v1081_v32  ;;  %vm1090_vm12 = vweird.f32 %v1081_v32 }
 0x539   :  { %v1097_v12 = vor.u32 1.1754944e-38, %v1096_v36  ;;  %vm1095_vm14 = vcmp.eq.f32.partialorder %v1094_v25, 8.507059e+37 }
 0x53d   :  { %v2116_v34 = vpop.eup %2115 }
 0x53e   :  { %v1086_v35 = vmul.f32 %v2116_v34, %v1081_v32  ;;  %vm1091_vm11 = vweird.f32 %v2116_v34 }
 0x53f   :  { %vm1092_vm13 = vmor %vm1090_vm12, %vm1091_vm11 }
 0x540   :  { %v1087_v37 = vsub.f32 1.0, %v1086_v35 }
 0x542   :  { %v1088_v33 = vmul.f32 %v2116_v34, %v1087_v37 }
 0x544   :  { %v1089_v38 = vadd.f32 %v2116_v34, %v1088_v33 }
 0x546   :  { %v1093_v39 = vsel %vm1092_vm13, %v2116_v34, %v1089_v38  ;;  %vm1231_vm13 = vcmask 1043456  }
 0x547   :  { %v2597_v40 = vsel %vm1095_vm14, %v1097_v12, %v1093_v39 }
 0x548   :  { %v1120_v41 = vperm.slane %v2597_v40, 5  ;;  %v1115_v54 = vperm.slane %v2597_v40, 0  ;;  %v1121_v55 = vperm.slane %v2597_v40, 6  ;;  %v1116_v59 = vperm.slane %v2597_v40, 1 }
 0x549   :  { %v1118_v21 = vperm.slane %v2597_v40, 3  ;;  %v1119_v51 = vperm.slane %v2597_v40, 4 }
 0x54a   :  { %v1152_v48 = vmul.f32 %v2502_v44, %v1120_v41  ;;  %v1147_v42 = vmul.f32 %v2504_v47, %v1115_v54  ;;  %v1153_v43 = vmul.f32 %v2540_v60, %v1121_v55  ;;  %v1148_v57 = vmul.f32 %v2514_v53, %v1116_v59 }
 0x54b   :  { %v1117_v44 = vperm.slane %v2597_v40, 2  ;;  %v1150_v7 = vmul.f32 %v2507_v49, %v1118_v21  ;;  %v1151_v58 = vmul.f32 %v2535_v9, %v1119_v51 }
 0x54c   :  { %v1168_v46 = vpack.c.bf16 %v1152_v48, %v1152_v48  ;;  %v1163_v8 = vpack.c.bf16 %v1147_v42, %v1147_v42  ;;  %v1169_v18 = vpack.c.bf16 %v1153_v43, %v1153_v43  ;;  %v1164_v61 = vpack.c.bf16 %v1148_v57, %v1148_v57 }
 0x54d   :  { %v1149_v47 = vmul.f32 %v2524_v0, %v1117_v44  ;;  %v1166_v53 = vpack.c.bf16 %v1150_v7, %v1150_v7  ;;  %v1167_v20 = vpack.c.bf16 %v1151_v58, %v1151_v58 }
 0x54e   :  { %v1185_v50 = vunpack.c.l.b16 %v1168_v46  ;;  %v1180_v52 = vunpack.c.l.b16 %v1163_v8  ;;  %v1186_v56 = vunpack.c.l.b16 %v1169_v18  ;;  %v1181_v45 = vunpack.c.l.b16 %v1164_v61 }
 0x54f   :  { %v1165_v60 = vpack.c.bf16 %v1149_v47, %v1149_v47  ;;  %v1183_v14 = vunpack.c.l.b16 %v1166_v53  ;;  %v1184_v27 = vunpack.c.l.b16 %v1167_v20  ;;  %v1122_v47 = vperm.slane %v2597_v40, 7 }
 0x550   :  { %1204 = vperm.xlu2 %2061, %v1185_v50   ;;  %1189 = vperm.xlu0 %2060, %v1180_v52  }
 0x551   :  { %1207 = vperm.xlu1 %2062, %v1186_v56   ;;  %v1182_v6 = vunpack.c.l.b16 %v1165_v60  ;;  %v1154_v21 = vmul.f32 %v2528_v3, %v1122_v47  ;;  %v2036_v3 = vld [vmem:[%s2804_s2] sm:$0xff] }
 0x552   :  { %1377 = vmatpush.bf16.msrb.mxu3 %v2036_v3 }
 0x558   :  { %1192 = vperm.xlu0 %2060, %v1181_v45  }
 0x55d   :  { %v1084_v22 = vpop.xlane.xlu1 %1083 }
 0x55e   :  { %2117 = vrcp.f32 %v1084_v22  ;;  %v1110_v0 = vand.u32 2147483648, %v1084_v22  ;;  %v1108_v63 = vand.u32 2147483647, %v1084_v22  ;;  %vm1104_vm2 = vweird.f32 %v1084_v22 }
 0x560   :  { %1195 = vperm.xlu0 %2060, %v1182_v6   ;;  %v1111_v49 = vor.u32 1.1754944e-38, %v1110_v0  ;;  %vm1109_vm12 = vcmp.eq.f32.partialorder %v1108_v63, 8.507059e+37 }
 0x564   :  { %v2118_v10 = vpop.eup %2117 }
 0x565   :  { %v1100_v13 = vmul.f32 %v2118_v10, %v1084_v22  ;;  %vm1105_vm15 = vweird.f32 %v2118_v10  ;;  %v1170_v22 = vpack.c.bf16 %v1154_v21, %v1154_v21 }
 0x566   :  { %vm1106_vm11 = vmor %vm1104_vm2, %vm1105_vm15 }
 0x567   :  { %v1101_v16 = vsub.f32 1.0, %v1100_v13  ;;  %v1187_v6 = vunpack.c.l.b16 %v1170_v22 }
 0x568   :  { %1198 = vperm.xlu0 %2060, %v1183_v14  }
 0x569   :  { %v1102_v5 = vmul.f32 %v2118_v10, %v1101_v16 }
 0x56b   :  { %v1103_v17 = vadd.f32 %v2118_v10, %v1102_v5 }
 0x56d   :  { %v1107_v4 = vsel %vm1106_vm11, %v2118_v10, %v1103_v17 }
 0x56e   :  { %v1112_v26 = vsel %vm1109_vm12, %v1111_v49, %v1107_v4 }
 0x56f   :  { %v1126_v11 = vperm.slane %v1112_v26, 3  ;;  %v1125_v29 = vperm.slane %v1112_v26, 2  ;;  %v1123_v15 = vperm.slane %v1112_v26, 0  ;;  %v1130_v9 = vperm.slane %v1112_v26, 7 }
 0x570   :  { %1201 = vperm.xlu0 %2060, %v1184_v27   ;;  %v1129_v37 = vperm.slane %v1112_v26, 6  ;;  %v1124_v36 = vperm.slane %v1112_v26, 1  ;;  %v1127_v43 = vperm.slane %v1112_v26, 4  ;;  %v1128_v57 = vperm.slane %v1112_v26, 5 }
 0x571   :  { %v1158_v32 = vmul.f32 %v2555_v28, %v1126_v11  ;;  %v1157_v34 = vmul.f32 %v2518_v62, %v1125_v29  ;;  %v1155_v35 = vmul.f32 %v2545_v19, %v1123_v15  ;;  %v1162_v12 = vmul.f32 %v2562_v31, %v1130_v9  ;;  %v2622_v62 = vld [vmem:[%s2802_s0] sm:$0xff]  ;;  %v2629_v28 = vld [vmem:[%s2802_s0 + $0x8] sm:$0xff] }
 0x572   :  { %v1161_v55 = vmul.f32 %v2526_v2, %v1129_v37  ;;  %v1156_v48 = vmul.f32 %v2550_v23, %v1124_v36  ;;  %v1171_v19 = vpack.c.bf16 %v2622_v62, %v2622_v62  ;;  %v1256_v2 = vpack.c.bf16 %v2629_v28, %v2629_v28 }
 0x573   :  { %v1251_v33 = vpack.c.bf16 %v1158_v32, %v1158_v32  ;;  %v1250_v25 = vpack.c.bf16 %v1157_v34, %v1157_v34  ;;  %v1248_v38 = vpack.c.bf16 %v1155_v35, %v1155_v35  ;;  %v1255_v23 = vpack.c.bf16 %v1162_v12, %v1162_v12 }
 0x574   :  { %v1254_v31 = vpack.c.bf16 %v1161_v55, %v1161_v55  ;;  %v1249_v42 = vpack.c.bf16 %v1156_v48, %v1156_v48  ;;  %v1233_v59 = vsel %vm1231_vm13, %v1171_v19, 0  ;;  %v1317_v46 = vsel %vm1231_vm13, %v1256_v2, 0 }
 0x575   :  { %v1268_v39 = vunpack.c.l.b16 %v1251_v33  ;;  %v1267_v41 = vunpack.c.l.b16 %v1250_v25  ;;  %v1265_v54 = vunpack.c.l.b16 %v1248_v38  ;;  %1242 = vmatpush.bf16.msrb.mxu0 %v1233_v59  ;;  %1326 = vmatpush.bf16.msrb.mxu1 %v1317_v46  ;;  %v1272_v8 = vunpack.c.l.b16 %v1255_v23 }
 0x576   :  { %v1271_v18 = vunpack.c.l.b16 %v1254_v31  ;;  %v1266_v50 = vunpack.c.l.b16 %v1249_v42  ;;  %v1159_v52 = vmul.f32 %v2559_v30, %v1127_v43  ;;  %v1160_v44 = vmul.f32 %v2516_v24, %v1128_v57  ;;  %v2037_v24 = vld [vmem:[%s2804_s2 + $0x8] sm:$0xff] }
 0x577   :  { %1283 = vperm.xlu1 %2062, %v1268_v39   ;;  %1280 = vperm.xlu2 %2061, %v1267_v41  }
 0x578   :  { %1274 = vperm.xlu0 %2060, %v1265_v54   ;;  %v1252_v56 = vpack.c.bf16 %v1159_v52, %v1159_v52  ;;  %v1253_v45 = vpack.c.bf16 %v1160_v44, %v1160_v44  ;;  %1354 = vmatpush.bf16.msrb.mxu2 %v2037_v24  ;;  %v1332_v52 = vpack.c.bf16 %v2629_v28, %v2622_v62 }
 0x57a   :  { %v1269_v61 = vunpack.c.l.b16 %v1252_v56  ;;  %v1270_v60 = vunpack.c.l.b16 %v1253_v45  ;;  %1960 = vmatmul.msk.bf16.vlgmr.msrb.gmra.mxu3 %vm120_vm0, %v1332_v52  ;;  %v2040_v52 = vld [vmem:[%s2803_s1 + $0x40] sm:$0xff] }
 0x57f   :  { %1295 = vperm.xlu1 %2062, %v1272_v8   ;;  %1292 = vperm.xlu2 %2061, %v1271_v18  }
 0x580   :  { %1277 = vperm.xlu0 %2060, %v1266_v50  }
 0x588   :  { %1286 = vperm.xlu0 %2060, %v1269_v61  }
 0x590   :  { %1289 = vperm.xlu0 %2060, %v1270_v60   ;;  %v2074_v60 = vld [vmem:[%s2805_s3 + $0xc] ss:$0 sm:$0xff] }
 0x598   :  { %1210 = vperm.xlu0 %2060, %v1187_v6  }
 0x5aa   :  { %v1205_v14 = vpop.permute.xlu2 %1204 }
 0x5ab   :  { %v1217_v2 = vperm.slane %v1205_v14, %v2289_v1 }
 0x5c2   :  { %v1190_v30 = vpop.permute.xlu0 %1189 }
 0x5c3   :  { %v1208_v58 = vpop.permute.xlu1 %1207  ;;  %v1212_v29 = vperm.slane %v1190_v30, %v2289_v1 }
 0x5c4   :  { %v1218_v43 = vperm.slane %v1208_v58, %v2289_v1 }
 0x5ca   :  { %v1193_v7 = vpop.permute.xlu0 %1192 }
 0x5cb   :  { %v1213_v4 = vperm.slane %v1193_v7, %v2289_v1 }
 0x5cd   :  { %v1220_v36 = vsel %vm871_vm3, %v1213_v4, %v1212_v29 }
 0x5d1   :  { %v1281_v16 = vpop.permute.xlu2 %1280 }
 0x5d2   :  { %v1196_v53 = vpop.permute.xlu0 %1195  ;;  %v1299_v49 = vperm.slane %v1281_v16, %v2289_v1 }
 0x5d3   :  { %v1214_v26 = vperm.slane %v1196_v53, %v2289_v1 }
 0x5d5   :  { %v1221_v38 = vsel %vm873_vm4, %v1214_v26, %v1220_v36 }
 0x5d9   :  { %v1293_v15 = vpop.permute.xlu2 %1292 }
 0x5da   :  { %v1199_v51 = vpop.permute.xlu0 %1198  ;;  %v1303_v12 = vperm.slane %v1293_v15, %v2289_v1 }
 0x5db   :  { %v1215_v9 = vperm.slane %v1199_v51, %v2289_v1 }
 0x5dd   :  { %v1222_v41 = vsel %vm875_vm5, %v1215_v9, %v1221_v38 }
 0x5e2   :  { %v1202_v10 = vpop.permute.xlu0 %1201 }
 0x5e3   :  { %v1216_v34 = vperm.slane %v1202_v10, %v2289_v1 }
 0x5e5   :  { %v1223_v48 = vsel %vm877_vm6, %v1216_v34, %v1222_v41 }
 0x5e6   :  { %v1224_v42 = vsel %vm879_vm7, %v1217_v2, %v1223_v48  ;;  %v2075_v48 = vld [vmem:[%s2805_s3 + $0xd] ss:$0 sm:$0xff] }
 0x5e7   :  { %v1225_v8 = vsel %vm881_vm8, %v1218_v43, %v1224_v42 }
 0x5e9   :  { %v1284_v0 = vpop.permute.xlu1 %1283 }
 0x5ea   :  { %v1275_v13 = vpop.permute.xlu0 %1274  ;;  %v1300_v32 = vperm.slane %v1284_v0, %v2289_v1  ;;  %v1449_v0 = vld [vmem:[%s2804_s2 + $0x18] sm:$0xf] }
 0x5eb   :  { %v1297_v20 = vperm.slane %v1275_v13, %v2289_v1 }
 0x5f1   :  { %v1296_v35 = vpop.permute.xlu1 %1295 }
 0x5f2   :  { %v1278_v40 = vpop.permute.xlu0 %1277  ;;  %v1304_v54 = vperm.slane %v1296_v35, %v2289_v1 }
 0x5f3   :  { %v1298_v5 = vperm.slane %v1278_v40, %v2289_v1 }
 0x5f5   :  { %v1305_v17 = vsel %vm871_vm3, %v1298_v5, %v1297_v20  ;;  %v1489_v5 = vunpack.c.l.b16 %v1449_v0 }
 0x5f6   :  { %v1306_v27 = vsel %vm873_vm4, %v1299_v49, %v1305_v17  ;;  %v2038_v17 = vld [vmem:[%s2804_s2 + $0x10] sm:$0xff]  ;;  %v1453_v49 = vld [vmem:[%s2804_s2 + $0x28] sm:$0xf]  ;;  %vm1463_vm4 = vcmask 195584  }
 0x5f7   :  { %v1307_v33 = vsel %vm875_vm5, %v1300_v32, %v1306_v27  ;;  %v1459_v4 = vunpack.c.l.b16 %v1453_v49  ;;  %vm1711_vm5 = vcmp.eq.s32.totalorder %v2289_v1, 0 }
 0x5f9   :  { %v1461_v26 = vpack.c.b16 %v1459_v4, %v1459_v4 }
 0x5fa   :  { %v1287_v63 = vpop.permute.xlu0 %1286 }
 0x5fb   :  { %v1301_v11 = vperm.slane %v1287_v63, %v2289_v1  ;;  %v1491_v63 = vpack.c.b16 %v1489_v5, %v1489_v5 }
 0x5fd   :  { %v1308_v39 = vsel %vm877_vm6, %v1301_v11, %v1307_v33  ;;  %v1379_v47 = vpop.f32.mrf.mxu3  ;;  %v1497_v20 = vsel %vm1231_vm13, %v1491_v63, 0  ;;  %v1468_v11 = vsel %vm1231_vm13, %v1461_v26, 0  ;;  %v2045_v26 = vld [vmem:[%s2803_s1 + $0x68] sm:$0xff]  ;;  %vm1725_vm6 = vcmask 58368  }
 0x5fe   :  { %1505 = vmatpush.bf16.msra.mxu3 %v1497_v20  ;;  %1476 = vmatpush.bf16.msra.mxu2 %v1468_v11 }
 0x602   :  { %v1290_v37 = vpop.permute.xlu0 %1289  ;;  %1506 = vmatpush.bf16.msra.mxu3 %v2038_v17 }
 0x603   :  { %v1302_v25 = vperm.slane %v1290_v37, %v2289_v1 }
 0x605   :  { %v1309_v55 = vsel %vm879_vm7, %v1302_v25, %v1308_v39  ;;  %v1381_v53 = vpop.f32.mrf.mxu3  ;;  %v2039_v25 = vld [vmem:[%s2804_s2 + $0x20] sm:$0xff] }
 0x606   :  { %v1310_v19 = vsel %vm881_vm8, %v1303_v12, %v1309_v55  ;;  %1477 = vmatpush.bf16.msra.mxu2 %v2039_v25  ;;  %v2047_v25 = vld [vmem:[%s2803_s1 + $0x78] sm:$0xff] }
 0x607   :  { %v1311_v23 = vsel %vm883_vm9, %v1304_v54, %v1310_v19  ;;  %v2041_v54 = vld [vmem:[%s2803_s1 + $0x48] sm:$0xff]  ;;  %1685 = vmatpush.bf16.msrb.mxu3 %v2047_v25 }
 0x608   :  { %v1312_v31 = vpack.c.b16 %v1311_v23, %v1311_v23 }
 0x60a   :  { %1950 = vmatmul.msk.bf16.vlgmr.msrb.gmra.mxu1 %vm894_vm10, %v1312_v31  ;;  %v1211_v59 = vpop.permute.xlu0 %1210 }
 0x60b   :  { %v1219_v46 = vperm.slane %v1211_v59, %v2289_v1 }
 0x60d   :  { %v1226_v18 = vsel %vm883_vm9, %v1219_v46, %v1225_v8 }
 0x60e   :  { %v1227_v50 = vpack.c.b16 %v1226_v18, %v1226_v18 }
 0x610   :  { %1949 = vmatmul.msk.bf16.vlgmr.msrb.gmra.mxu0 %vm894_vm10, %v1227_v50 }
 0x687   :  { %v1328_v56 = vpop.f32.mrf.mxu1 }
 0x68d   :  { %v1244_v57 = vpop.f32.mrf.mxu0 }
 0x68e   :  { %v1335_v61 = vpack.c.bf16 %v1328_v56, %v1244_v57 }
 0x68f   :  { %v1330_v44 = vpop.f32.mrf.mxu1 }
 0x690   :  { %1955 = vmatmul.msk.bf16.vlgmr.msrb.gmra.mxu2 %vm120_vm0, %v1335_v61 }
 0x691   :  { %1645 = vmatpush.bf16.msrb.mxu2 %v2045_v26 }
 0x695   :  { %v1246_v45 = vpop.f32.mrf.mxu0 }
 0x713   :  { %v1356_v21 = vpop.f32.mrf.mxu2 }
 0x714   :  { %v1380_v22 = vadd.f32 %v1379_v47, %v1356_v21  ;;  %v2042_v47 = vld [vmem:[%s2803_s1 + $0x50] sm:$0xff] }
 0x716   :  { %v1386_v6 = vadd.f32 %v2074_v60, %v1380_v22 }
 0x718   :  { %v1388_v30 = vmul.f32 0.01, %v1386_v6 }
 0x71a   :  { %v1390_v7 = vmax.f32 %v1386_v6, %v1388_v30 }
 0x71b   :  { %v1358_v51 = vpop.f32.mrf.mxu2 }
 0x71c   :  { %v1382_v10 = vadd.f32 %v1381_v53, %v1358_v51  ;;  %1394 = vrot.lane.b32.xlu2 %v1390_v7, %s2153_s28  ;;  %v1402_v13 = vpack.c.bf16 %v1390_v7, %v1390_v7 }
 0x71e   :  { %v1387_v14 = vadd.f32 %v2074_v60, %v1382_v10  ;;  %v1404_v58 = vsel %vm1231_vm13, %v1402_v13, 0 }
 0x71f   :  { %1413 = vmatpush.bf16.msra.mxu0 %v1404_v58 }
 0x720   :  { %v1389_v24 = vmul.f32 0.01, %v1387_v14 }
 0x722   :  { %1961 = vmatmul.msk.bf16.vlgmr.msra.gmra.mxu0 %vm894_vm10, %v1227_v50  ;;  %v1391_v3 = vmax.f32 %v1387_v14, %v1389_v24 }
 0x723   :  { %1565 = vmatpush.bf16.msrb.mxu0 %v2041_v54 }
 0x724   :  { %1396 = vrot.lane.b32.xlu0 %v1391_v3, %s2153_s28  ;;  %v1419_v40 = vpack.c.bf16 %v1391_v3, %v1391_v3 }
 0x726   :  { %v1421_v16 = vsel %vm1231_vm13, %v1419_v40, 0  ;;  %v2076_v40 = vld [vmem:[%s2805_s3 + $0x6] ss:$0 sm:$0xff] }
 0x727   :  { %1430 = vmatpush.bf16.msra.mxu1 %v1421_v16  ;;  %1566 = vmatpush.bf16.msrb.mxu0 %v2040_v52 }
 0x72a   :  { %1962 = vmatmul.msk.bf16.vlgmr.msra.gmra.mxu1 %vm894_vm10, %v1312_v31 }
 0x776   :  { %v1395_v27 = vpop.permute.xlu2 %1394 }
 0x777   :  { %v1400_v15 = vsel %vm120_vm0, %v2622_v62, %v1395_v27  ;;  %v2044_v27 = vld [vmem:[%s2803_s1 + $0x60] sm:$0xff] }
 0x778   :  { %1646 = vmatpush.bf16.msrb.mxu2 %v2044_v27 }
 0x796   :  { %v1397_v29 = vpop.permute.xlu0 %1396 }
 0x797   :  { %v1401_v9 = vsel %vm120_vm0, %v2629_v28, %v1397_v29  ;;  %v2077_v29 = vld [vmem:[%s2805_s3 + $0x7] ss:$0 sm:$0xff] }
 0x798   :  { %v1446_v32 = vpack.c.bf16 %v1401_v9, %v1400_v15 }
 0x79a   :  { %1972 = vmatmul.msk.bf16.vlgmr.msra.gmra.mxu3 %vm1463_vm4, %v1446_v32 }
 0x79f   :  { %v1415_v34 = vpop.f32.mrf.mxu0 }
 0x7a7   :  { %v1417_v35 = vpop.f32.mrf.mxu0  ;;  %v1432_v37 = vpop.f32.mrf.mxu1 }
 0x7a8   :  { %v2063_v36 = vpack.i.bf16 %v1432_v37, %v1415_v34 }
 0x7aa   :  { %2064 = vrot.lane.b32.xlu1 %v2063_v36, %s2153_s28 }
 0x7af   :  { %v1434_v33 = vpop.f32.mrf.mxu1 }
 0x81c   :  { %v2065_v62 = vpop.permute.xlu1 %2064 }
 0x81d   :  { %v2067_v38 = vunpack.i.h.bf16 %v2065_v62  ;;  %v2066_v12 = vunpack.i.l.bf16 %v2065_v62  ;;  %v1508_v55 = vpop.f32.mrf.mxu3  ;;  %v2046_v62 = vld [vmem:[%s2803_s1 + $0x70] sm:$0xff] }
 0x81e   :  { %1686 = vmatpush.bf16.msrb.mxu3 %v2046_v62 }
 0x81f   :  { %v1445_v28 = vsel %vm120_vm0, %v1328_v56, %v2067_v38  ;;  %v1444_v39 = vsel %vm120_vm0, %v1244_v57, %v2066_v12  ;;  %v2043_v56 = vld [vmem:[%s2803_s1 + $0x58] sm:$0xff]  ;;  %vm1796_vm0 = vcmask 1040384   ;;  %v2048_v12 = vld [vmem:[%s2804_s2 + $0x30] sm:$0xff] }
 0x820   :  { %v1450_v41 = vpack.c.bf16 %v1445_v28, %v1444_v39  ;;  %1605 = vmatpush.bf16.msrb.mxu1 %v2043_v56  ;;  %v2049_v38 = vld [vmem:[%s2804_s2 + $0x38] sm:$0xff]  ;;  %v2078_v39 = vld [vmem:[%s2805_s3 + $0x8] ss:$0 sm:$0xff] }
 0x822   :  { %1967 = vmatmul.msk.bf16.vlgmr.msra.gmra.mxu2 %vm1463_vm4, %v1450_v41  ;;  %1861 = vmatpush.bf16.msra.mxu3 %v2049_v38 }
 0x824   :  { %1606 = vmatpush.bf16.msrb.mxu1 %v2042_v47 }
 0x825   :  { %v1510_v43 = vpop.f32.mrf.mxu3 }
 0x826   :  { %1862 = vmatpush.bf16.msra.mxu3 %v2048_v12 }
 0x8a5   :  { %v1479_v19 = vpop.f32.mrf.mxu2 }
 0x8a6   :  { %v1509_v2 = vadd.f32 %v1508_v55, %v1479_v19 }
 0x8a8   :  { %v1515_v23 = vadd.f32 %v2075_v48, %v1509_v2 }
 0x8aa   :  { %v1517_v31 = vmul.f32 0.01, %v1515_v23 }
 0x8ac   :  { %v1519_v42 = vmax.f32 %v1515_v23, %v1517_v31 }
 0x8ad   :  { %v1481_v59 = vpop.f32.mrf.mxu2 }
 0x8ae   :  { %v1511_v46 = vadd.f32 %v1510_v43, %v1481_v59  ;;  %1523 = vrot.lane.b32.xlu2 %v1519_v42, %s2154_s15  ;;  %v2079_v43 = vld [vmem:[%s2805_s3 + $0x9] ss:$0 sm:$0xff] }
 0x8b0   :  { %v1516_v8 = vadd.f32 %v2075_v48, %v1511_v46 }
 0x8b2   :  { %v1518_v18 = vmul.f32 0.01, %v1516_v8 }
 0x8b4   :  { %v1520_v50 = vmax.f32 %v1516_v8, %v1518_v18  ;;  %v2080_v18 = vld [vmem:[%s2805_s3 + $0xa] ss:$0 sm:$0xff] }
 0x8b6   :  { %1525 = vrot.lane.b32.xlu0 %v1520_v50, %s2154_s15 }
 0x908   :  { %v1524_v57 = vpop.permute.xlu2 %1523 }
 0x909   :  { %v1529_v61 = vsel %vm1463_vm4, %v1400_v15, %v1524_v57 }
 0x90a   :  { %v1751_v44 = vpack.c.bf16 %v1529_v61, %v1529_v61  ;;  %v1531_v60 = vperm.slane %v1529_v61, 0 }
 0x90c   :  { %v1756_v45 = vsel %vm1231_vm13, %v1751_v44, 0  ;;  %v1532_v6 = vsub.f32 %v1531_v60, %v1529_v61 }
 0x90d   :  { %1765 = vmatpush.bf16.msra.mxu0 %v1756_v45 }
 0x90e   :  { %v1533_v14 = vand.u32 2147483647, %v1532_v6  ;;  %v2081_v6 = vld [vmem:[%s2805_s3 + $0xb] ss:$0 sm:$0xff] }
 0x928   :  { %v1526_v21 = vpop.permute.xlu0 %1525 }
 0x929   :  { %v1530_v22 = vsel %vm1463_vm4, %v1401_v9, %v1526_v21 }
 0x92a   :  { %v1534_v30 = vperm.slane %v1530_v22, 0  ;;  %v1799_v7 = vrot.slane %v1530_v22, 7  ;;  %v1771_v53 = vpack.c.bf16 %v1530_v22, %v1530_v22 }
 0x92c   :  { %v1535_v51 = vsub.f32 %v1534_v30, %v1530_v22  ;;  %v1801_v10 = vsel %vm1796_vm0, %v1529_v61, %v1799_v7  ;;  %v1778_v13 = vsel %vm1231_vm13, %v1771_v53, 0 }
 0x92d   :  { %1787 = vmatpush.bf16.msra.mxu1 %v1778_v13  ;;  %v1802_v42 = vpack.c.bf16 %v1801_v10, %v1801_v10 }
 0x92e   :  { %v1536_v58 = vand.u32 2147483647, %v1535_v51 }
 0x930   :  { %v1537_v24 = vpack.c.bf16 %v1536_v58, %v1533_v14 }
 0x932   :  { %1981 = vmatmul.msk.bf16.vlgmr.msrb.gmra.mxu0 %vm252_vm1, %v1537_v24 }
 0x9af   :  { %v1568_v3 = vpop.f32.mrf.mxu0 }
 0x9b0   :  { %v1569_v16 = vadd.f32 %v2076_v40, %v1568_v3 }
 0x9b2   :  { %v1573_v5 = vmul.f32 0.01, %v1569_v16 }
 0x9b4   :  { %v1575_v17 = vmax.f32 %v1569_v16, %v1573_v5 }
 0x9b7   :  { %v1570_v0 = vpop.f32.mrf.mxu0 }
 0x9b8   :  { %v1571_v63 = vadd.f32 %v2076_v40, %v1570_v0 }
 0x9ba   :  { %v1574_v20 = vmul.f32 0.01, %v1571_v63 }
 0x9bc   :  { %v1576_v49 = vmax.f32 %v1571_v63, %v1574_v20 }
 0x9be   :  { %v1577_v4 = vpack.c.bf16 %v1576_v49, %v1575_v17 }
 0x9c0   :  { %1990 = vmatmul.msk.bf16.vlgmr.msrb.gmra.mxu1 %vm252_vm1, %v1577_v4 }
 0xa3d   :  { %v1608_v11 = vpop.f32.mrf.mxu1 }
 0xa3e   :  { %v1609_v15 = vadd.f32 %v2077_v29, %v1608_v11 }
 0xa40   :  { %v1613_v32 = vmul.f32 0.01, %v1609_v15 }
 0xa42   :  { %v1615_v37 = vmax.f32 %v1609_v15, %v1613_v32 }
 0xa45   :  { %v1610_v9 = vpop.f32.mrf.mxu1 }
 0xa46   :  { %v1611_v34 = vadd.f32 %v2077_v29, %v1610_v9 }
 0xa48   :  { %v1614_v35 = vmul.f32 0.01, %v1611_v34 }
 0xa4a   :  { %v1616_v36 = vmax.f32 %v1611_v34, %v1614_v35 }
 0xa4c   :  { %v1617_v33 = vpack.c.bf16 %v1616_v36, %v1615_v37  ;;  %v2051_v36 = vld [vmem:[%s2804_s2 + $0x48] sm:$0xff] }
 0xa4d   :  { %1833 = vmatpush.bf16.msra.mxu2 %v2051_v36 }
 0xa4e   :  { %1999 = vmatmul.msk.bf16.vlgmr.msrb.gmra.mxu2 %vm252_vm1, %v1617_v33  ;;  %v2050_v33 = vld [vmem:[%s2804_s2 + $0x40] sm:$0xff] }
 0xa51   :  { %1834 = vmatpush.bf16.msra.mxu2 %v2050_v33 }
 0xad1   :  { %v1648_v28 = vpop.f32.mrf.mxu2 }
 0xad2   :  { %v1649_v41 = vadd.f32 %v2078_v39, %v1648_v28 }
 0xad4   :  { %v1653_v55 = vmul.f32 0.01, %v1649_v41 }
 0xad6   :  { %v1655_v2 = vmax.f32 %v1649_v41, %v1653_v55 }
 0xad9   :  { %v1650_v54 = vpop.f32.mrf.mxu2 }
 0xada   :  { %v1651_v48 = vadd.f32 %v2078_v39, %v1650_v54  ;;  %v2082_v54 = vld [vmem:[%s2805_s3 + $0xe] ss:$0 sm:$0xff] }
 0xadc   :  { %v1654_v19 = vmul.f32 0.01, %v1651_v48 }
 0xade   :  { %v1656_v23 = vmax.f32 %v1651_v48, %v1654_v19 }
 0xae0   :  { %v1657_v31 = vpack.c.bf16 %v1656_v23, %v1655_v2 }
 0xae2   :  { %2008 = vmatmul.msk.bf16.vlgmr.msrb.gmra.mxu3 %vm252_vm1, %v1657_v31 }
 0xaf2   :  { %2028 = vmatmul.msk.bf16.vlgmr.msra.gmra.mxu3 %vm252_vm1, %v1802_v42 }
 0xb65   :  { %v1688_v59 = vpop.f32.mrf.mxu3 }
 0xb66   :  { %v1689_v46 = vadd.f32 %v2079_v43, %v1688_v59 }
 0xb68   :  { %v1693_v8 = vmul.f32 0.01, %v1689_v46 }
 0xb6a   :  { %v1695_v50 = vmax.f32 %v1689_v46, %v1693_v8 }
 0xb6c   :  { %v1700_v52 = vmul.f32 %v2080_v18, %v1695_v50 }
 0xb6d   :  { %v1690_v56 = vpop.f32.mrf.mxu3 }
 0xb6e   :  { %v1691_v57 = vadd.f32 %v2079_v43, %v1690_v56  ;;  %v1702_v61 = vsel %vm252_vm1, %v1700_v52, 0.0 }
 0xb6f   :  { %1703 = vadd.xlane.f32.xlu1 %v1702_v61 }
 0xb70   :  { %v1694_v44 = vmul.f32 0.01, %v1691_v57 }
 0xb72   :  { %v1696_v45 = vmax.f32 %v1691_v57, %v1694_v44 }
 0xb74   :  { %v1701_v47 = vmul.f32 %v2080_v18, %v1696_v45 }
 0xb75   :  { %v2772_v60 = vpop.f32.mrf.mxu3 }
 0xb76   :  { %v1705_v21 = vsel %vm252_vm1, %v1701_v47, 0.0 }
 0xb77   :  { %1706 = vadd.xlane.f32.xlu2 %v1705_v21 }
 0xb7d   :  { %v1866_v22 = vpop.f32.mrf.mxu3 }
 0xbe2   :  { %v1704_v30 = vpop.xlane.xlu1 %1703 }
 0xbe3   :  { %v1709_v7 = vadd.f32 %v2081_v6, %v1704_v30 }
 0xbe5   :  { %1715 = vperm.xlu0 %2060, %v1709_v7  }
 0xbea   :  { %v1707_v53 = vpop.xlane.xlu2 %1706 }
 0xbeb   :  { %v1710_v51 = vadd.f32 %v2081_v6, %v1707_v53 }
 0xbed   :  { %1718 = vperm.xlu0 %2060, %v1710_v51  }
 0xc57   :  { %v1716_v10 = vpop.permute.xlu0 %1715 }
 0xc58   :  { %v1720_v14 = vperm.slane %v1716_v10, %v2289_v1 }
 0xc5f   :  { %v1719_v13 = vpop.permute.xlu0 %1718 }
 0xc60   :  { %v1721_v58 = vperm.slane %v1719_v13, %v2289_v1 }
 0xc62   :  { %v1722_v24 = vsel %vm871_vm3, %v1721_v58, %v1720_v14 }
 0xc63   :  { %v1724_v3 = vsel %vm1711_vm5, -1e+09, %v1722_v24 }
 0xc64   :  { %v1726_v40 = vsel %vm1725_vm6, %v1724_v3, -inf }
 0xc65   :  { %1727 = vmax.xlane.f32.xlu0 %v1726_v40 }
 0xcd8   :  { %v1728_v16 = vpop.xlane.xlu0 %1727 }
 0xcd9   :  { %v1729_v0 = vsub.f32 %v1724_v3, %v1728_v16 }
 0xcdb   :  { %v1730_v5 = vmul.f32 1.442695, %v1729_v0 }
 0xcdd   :  { %2119 = vpow2.f32 %v1730_v5 }
 0xce3   :  { %v2120_v63 = vpop.eup %2119 }
 0xce4   :  { %v1732_v20 = vsel %vm1725_vm6, %v2120_v63, 0.0 }
 0xce5   :  { %1733 = vadd.xlane.f32.xlu1 %v1732_v20 }
 0xd58   :  { %v1734_v17 = vpop.xlane.xlu1 %1733 }
 0xd59   :  { %2121 = vrcp.f32 %v1734_v17  ;;  %v1746_v26 = vand.u32 2147483648, %v1734_v17  ;;  %v1744_v11 = vand.u32 2147483647, %v1734_v17  ;;  %vm1740_vm7 = vweird.f32 %v1734_v17 }
 0xd5b   :  { %v1747_v15 = vor.u32 1.1754944e-38, %v1746_v26  ;;  %vm1745_vm9 = vcmp.eq.f32.partialorder %v1744_v11, 8.507059e+37 }
 0xd5f   :  { %v2122_v49 = vpop.eup %2121 }
 0xd60   :  { %v1736_v4 = vmul.f32 %v2122_v49, %v1734_v17  ;;  %vm1741_vm3 = vweird.f32 %v2122_v49 }
 0xd61   :  { %vm1742_vm8 = vmor %vm1740_vm7, %vm1741_vm3 }
 0xd62   :  { %v1737_v1 = vsub.f32 1.0, %v1736_v4 }
 0xd64   :  { %v1738_v27 = vmul.f32 %v2122_v49, %v1737_v1 }
 0xd66   :  { %v1739_v29 = vadd.f32 %v2122_v49, %v1738_v27 }
 0xd68   :  { %v1743_v9 = vsel %vm1742_vm8, %v2122_v49, %v1739_v29 }
 0xd69   :  { %v1748_v32 = vsel %vm1745_vm9, %v1747_v15, %v1743_v9 }
 0xd6a   :  { %v1749_v34 = vmul.f32 %v2120_v63, %v1748_v32 }
 0xd6c   :  { %v1750_v35 = vpack.c.bf16 %v1749_v34, %v1749_v34 }
 0xd6e   :  { %2009 = vmatmul.msk.bf16.vlgmr.msra.gmra.mxu0 %vm894_vm10, %v1750_v35  ;;  %v1772_v37 = vshrl.u32 %v1750_v35, 16 }
 0xd70   :  { %2010 = vmatmul.msk.bf16.vlgmr.msra.gmra.mxu1 %vm894_vm10, %v1772_v37 }
 0xdeb   :  { %v1767_v25 = vpop.f32.mrf.mxu0 }
 0xded   :  { %v1789_v62 = vpop.f32.mrf.mxu1 }
 0xdee   :  { %v1794_v38 = vrot.slane %v1789_v62, 7 }
 0xdf0   :  { %v1797_v12 = vsel %vm1796_vm0, %v1767_v25, %v1794_v38 }
 0xdf1   :  { %v1807_v28 = vpack.c.bf16 %v1797_v12, %v1797_v12 }
 0xdf3   :  { %v1769_v39 = vpop.f32.mrf.mxu0  ;;  %2019 = vmatmul.msk.bf16.vlgmr.msra.gmra.mxu2 %vm252_vm1, %v1807_v28 }
 0xdf5   :  { %v1791_v41 = vpop.f32.mrf.mxu1 }
 0xe76   :  { %v1836_v55 = vpop.f32.mrf.mxu2 }
 0xe77   :  { %v1865_v48 = vadd.f32 %v2772_v60, %v1836_v55 }
 0xe79   :  { %v1870_v19 = vadd.f32 %v2082_v54, %v1865_v48 }
 0xe7b   :  { %1871 = vst.msk [vmem:[#allocation2] sm:$0x3] %vm1725_vm6, %v1870_v19 }
 0xe7c   :  { %1882 = dma.vmem_to_hbm [thread:$0]  %s1878_s24, 32, %s1880_s26, [#allocation3]  }
 0xe7e   :  { %v1838_v2 = vpop.f32.mrf.mxu2 }
 0xe7f   :  { %2149 = dma.done.wait [#allocation3], 32  }
 0xe80   :  { %2150 = vsyncadd [#allocation3], 4294967264 }
 0xe81   :  { %1887 = vsyncpa [#allocation3], 1 }

</bundles_post_ra>
